<compile_context>
chip_gen: v7x
topology: tpu7x:2x2x1
jax: 0.10.0
libtpu: 0.0.40
codegen_flags: <defaults>
</compile_context>

<pallas_src>
from types import SimpleNamespace

import jax
import jax.numpy as jnp
from jax import lax
from jax.experimental import pallas as pl
from jax.experimental.pallas import tpu as pltpu


_COMPILER_PARAMS = pltpu.CompilerParams(dimension_semantics=("arbitrary",))


# --------------------------------------------------------------------------
# Fused focal loss (CornerNet modified focal loss, _neg_loss) for one or more
# heatmap heads, with _sigmoid (sigmoid + clamp) fused on the raw logits.
# --------------------------------------------------------------------------
def focal_losses(pairs):
    """pairs: list of (logits (B,C,H,W), gt (B,ns,C,H,W)). -> tuple of (B,ns)."""
    B = pairs[0][0].shape[0]
    ns = pairs[0][1].shape[1]
    n_pairs = len(pairs)

    logit_args, gt_args, rows_list = [], [], []
    for logits, gt in pairs:
        n = 1
        for d in logits.shape[1:]:
            n *= d
        n_pad = ((n + 127) // 128) * 128
        lf = logits.astype(jnp.float32).reshape(B, n)
        gf = gt.astype(jnp.float32).reshape(B, ns, n)
        if n_pad != n:
            # pad logits with 0 (p=0.5) and gt with 2.0 (pos=neg=0) -> inert.
            lf = jnp.pad(lf, ((0, 0), (0, n_pad - n)), constant_values=0.0)
            gf = jnp.pad(gf, ((0, 0), (0, 0), (0, n_pad - n)), constant_values=2.0)
        rows = n_pad // 128
        logit_args.append(lf.reshape(B, rows, 128))
        gt_args.append(gf.reshape(B, ns, rows, 128))
        rows_list.append(rows)

    def kernel(*refs):
        b = pl.program_id(0)
        logit_refs = refs[:n_pairs]
        gt_refs = refs[n_pairs:2 * n_pairs]
        out_refs = refs[2 * n_pairs:]
        for i in range(n_pairs):
            x = logit_refs[i][...]                          # (rows, 128) raw logits
            p = jnp.clip(jax.nn.sigmoid(x), 1e-4, 1.0 - 1e-4)   # fused _sigmoid()
            # EUP-heavy terms computed ONCE and reused across all ns symmetries.
            logp = jnp.log(p)
            log1mp = jnp.log(1.0 - p)
            omp_sq = (1.0 - p) ** 2
            p_sq = p * p
            for s in range(ns):
                g = gt_refs[i][s]                           # (rows, 128)
                pos = (g == 1.0).astype(jnp.float32)
                neg = (g < 1.0).astype(jnp.float32)
                neg_w = (1.0 - g) ** 4
                pos_loss = jnp.sum(logp * omp_sq * pos)
                neg_loss = jnp.sum(log1mp * p_sq * neg_w * neg)
                num_pos = jnp.sum(pos)
                zero = (num_pos == 0.0).astype(jnp.float32)
                out_refs[i][b, s] = (-neg_loss * zero
                                     - (pos_loss + neg_loss) / (num_pos + zero)
                                     * (1.0 - zero))

    in_specs = (
        [pl.BlockSpec((None, rows, 128), lambda b: (b, 0, 0)) for rows in rows_list]
        + [pl.BlockSpec((None, ns, rows, 128), lambda b: (b, 0, 0, 0)) for rows in rows_list]
    )
    out_specs = tuple(pl.BlockSpec(memory_space=pltpu.MemorySpace.SMEM)
                      for _ in range(n_pairs))
    out_shape = tuple(jax.ShapeDtypeStruct((B, ns), jnp.float32)
                      for _ in range(n_pairs))

    results = pl.pallas_call(
        kernel,
        grid=(B,),
        in_specs=in_specs,
        out_specs=out_specs,
        out_shape=out_shape,
        compiler_params=_COMPILER_PARAMS,
    )(*logit_args, *gt_args)
    if not isinstance(results, (list, tuple)):
        results = (results,)
    return tuple(results)


# --------------------------------------------------------------------------
# Fused regression (masked L1) losses for all heads in ONE pallas_call.
# Gather is a one-hot MXU matmul; masked-L1 + normalization done on full
# (D, ns*K) blocks; per-symmetry reductions are static lane slices.
# --------------------------------------------------------------------------
def _prep_feat(o):       # (B, D, H, W) -> (B, D, H*W)   (free NCHW view, HW lane-dense)
    B, D, H, W = o.shape
    return o.astype(jnp.float32).reshape(B, D, H * W)


def _prep_target(x):     # (B, ns, K, D) -> (B, D, ns*K)  (tiny transpose)
    B, ns, K, D = x.shape
    return jnp.transpose(x.astype(jnp.float32), (0, 3, 1, 2)).reshape(B, D, ns * K)


def _prep_nodim_mask(m):  # (B, ns, K) -> (B, 1, ns*K)
    B, ns, K = m.shape
    return m.astype(jnp.float32).reshape(B, 1, ns * K)


def _prep_ind(ind):      # (B, ns, K) -> (B, 1, ns*K) int32
    B, ns, K = ind.shape
    return ind.astype(jnp.int32).reshape(B, 1, ns * K)


def reg_l1_losses(heads, ind_groups, ns):
    """heads: list of dicts {feat (B,D,HW), mask (B,1|D,nsK), target (B,D,nsK),
    group (int into ind_groups)}.  ind_groups: list of (B,1,nsK) int32 arrays.
    Returns tuple of (B, ns) losses, one per head."""
    B, _, HW = heads[0]["feat"].shape
    n_heads = len(heads)
    n_groups = len(ind_groups)
    group_nsk = [g.shape[2] for g in ind_groups]
    head_meta = [(h["feat"].shape[1], h["mask"].shape[1], h["group"],
                  h["target"].shape[2] // ns) for h in heads]   # (D, mask_rows, g, K)

    def kernel(*refs):
        b = pl.program_id(0)
        ind_refs = refs[:n_groups]
        feat_refs = refs[n_groups:n_groups + n_heads]
        mask_refs = refs[n_groups + n_heads:n_groups + 2 * n_heads]
        tgt_refs = refs[n_groups + 2 * n_heads:n_groups + 3 * n_heads]
        out_refs = refs[n_groups + 3 * n_heads:]

        # One one-hot matrix per index group (shared by the heads in the group).
        one_hots = []
        for g in range(n_groups):
            nsk = group_nsk[g]
            hw_iota = lax.broadcasted_iota(jnp.int32, (HW, nsk), 0)
            one_hots.append((hw_iota == ind_refs[g][...]).astype(jnp.float32))

        for h, (D, mask_rows, g, K) in enumerate(head_meta):
            nsk = group_nsk[g]
            # fused _transpose_and_gather_feat: single MXU matmul replaces the
            # K serialized (1, D) dynamic-slice gathers.
            pred = jnp.dot(feat_refs[h][...], one_hots[g],
                           preferred_element_type=jnp.float32)       # (D, nsK)
            m = mask_refs[h][...]
            if mask_rows == 1:
                m = jnp.broadcast_to(m, (D, nsk))                    # mask.expand_as(pred)
            t = tgt_refs[h][...]
            diff = jnp.abs(t * m - pred * m)                         # (D, nsK)
            for s in range(ns):
                sl = slice(s * K, (s + 1) * K)
                num = jnp.sum(diff[:, sl])
                den = jnp.sum(m[:, sl])
                out_refs[h][b, s] = num / (den + 1e-4)

    in_specs, args = [], []
    for g in ind_groups:
        nsk = g.shape[2]
        in_specs.append(pl.BlockSpec((None, 1, nsk), lambda b: (b, 0, 0)))
        args.append(g)
    for h in heads:
        D = h["feat"].shape[1]
        in_specs.append(pl.BlockSpec((None, D, HW), lambda b: (b, 0, 0)))
        args.append(h["feat"])
    for h in heads:
        r, nsk = h["mask"].shape[1], h["mask"].shape[2]
        in_specs.append(pl.BlockSpec((None, r, nsk), lambda b: (b, 0, 0)))
        args.append(h["mask"])
    for h in heads:
        D, nsk = h["target"].shape[1], h["target"].shape[2]
        in_specs.append(pl.BlockSpec((None, D, nsk), lambda b: (b, 0, 0)))
        args.append(h["target"])

    out_specs = tuple(pl.BlockSpec(memory_space=pltpu.MemorySpace.SMEM)
                      for _ in range(n_heads))
    out_shape = tuple(jax.ShapeDtypeStruct((B, ns), jnp.float32)
                      for _ in range(n_heads))

    results = pl.pallas_call(
        kernel,
        grid=(B,),
        in_specs=in_specs,
        out_specs=out_specs,
        out_shape=out_shape,
        compiler_params=_COMPILER_PARAMS,
    )(*args)
    if not isinstance(results, (list, tuple)):
        results = (results,)
    return tuple(results)


# --------------------------------------------------------------------------
# ObjectPoseLoss forward (standard CenterPose "train" configuration).
# --------------------------------------------------------------------------
def _combine(c, batch, cfg):
    loss = (cfg.hm_weight * c["hm"] + cfg.wh_weight * c["wh"] + cfg.off_weight * c["off"] +
            cfg.hp_weight * c["hp"] + cfg.hm_hp_weight * c["hm_hp"] +
            cfg.off_weight * c["hp_off"] + cfg.obj_scale_weight * c["scale"])   # (B, ns)
    valid = batch["ind"].sum(axis=2) > 0                                        # (B, ns)
    penal = jnp.where(valid, 0.0, jnp.inf)
    choice = jnp.argmin(loss * valid.astype(jnp.float32) + penal, axis=1)       # (B,)
    bidx = jnp.arange(loss.shape[0])

    def sel(x):
        if isinstance(x, (int, float)):
            return jnp.float32(x)
        return x[bidx, choice].mean()

    total = (cfg.hm_weight * sel(c["hm"]) + cfg.wh_weight * sel(c["wh"]) +
             cfg.off_weight * sel(c["off"]) + cfg.hp_weight * sel(c["hp"]) +
             cfg.hm_hp_weight * sel(c["hm_hp"]) + cfg.off_weight * sel(c["hp_off"]) +
             cfg.obj_scale_weight * sel(c["scale"]))
    return total


def object_pose_loss(outputs, batch, cfg, phase="train"):
    B, ns, K = batch["ind"].shape
    zero = jnp.zeros((B, ns), jnp.float32)
    c = {k: zero for k in ("hm", "wh", "hp", "off", "hm_hp", "hp_off", "scale")}

    ind_main = _prep_ind(batch["ind"])

    for s in range(cfg.num_stacks):
        out = outputs[s]

        # ---- focal heads (hm [+ hm_hp]) fused into ONE pallas_call ----
        focal_names = ["hm"]
        focal_pairs = [(out["hm"], batch["hm"])]
        if cfg.hm_hp and cfg.hm_hp_weight > 0:
            focal_names.append("hm_hp")
            focal_pairs.append((out["hm_hp"], batch["hm_hp"]))
        for name, res in zip(focal_names, focal_losses(focal_pairs)):
            c[name] = c[name] + res / cfg.num_stacks

        # ---- regression heads fused into ONE pallas_call ----
        # TODO(synk): dense_hp / hps_uncertainty (RegKLDKeyLoss) /
        # obj_scale_uncertainty (RegKLDScaleLoss) / relative_loss /
        # dimension_ref branches are not implemented (standard train config).
        ind_groups = [ind_main]
        reg_mask = _prep_nodim_mask(batch["reg_mask"])
        heads, head_names = [], []

        heads.append(dict(feat=_prep_feat(out["hps"]),
                          mask=_prep_target(batch["hps_mask"]),
                          target=_prep_target(batch["hps"]), group=0))
        head_names.append("hp")
        if cfg.reg_bbox and cfg.wh_weight > 0:
            heads.append(dict(feat=_prep_feat(out["wh"]), mask=reg_mask,
                              target=_prep_target(batch["wh"]), group=0))
            head_names.append("wh")
        if cfg.obj_scale and cfg.obj_scale_weight > 0:
            heads.append(dict(feat=_prep_feat(out["scale"]), mask=reg_mask,
                              target=_prep_target(batch["scale"]), group=0))
            head_names.append("scale")
        if cfg.reg_offset and cfg.off_weight > 0:
            heads.append(dict(feat=_prep_feat(out["reg"]), mask=reg_mask,
                              target=_prep_target(batch["reg"]), group=0))
            head_names.append("off")
        if cfg.reg_hp_offset and cfg.off_weight > 0:
            ind_groups.append(_prep_ind(batch["hp_ind"]))
            heads.append(dict(feat=_prep_feat(out["hp_offset"]),
                              mask=_prep_nodim_mask(batch["hp_mask"]),
                              target=_prep_target(batch["hp_offset"]),
                              group=len(ind_groups) - 1))
            head_names.append("hp_off")

        for name, res in zip(head_names, reg_l1_losses(heads, ind_groups, ns)):
            c[name] = c[name] + res / cfg.num_stacks

    return _combine(c, batch, cfg)


# --------------------------------------------------------------------------
# Pure-JAX reference (mirrors the PyTorch code) for correctness checking.
# --------------------------------------------------------------------------
def _ref_focal(logits, gt):
    pred = jnp.clip(jax.nn.sigmoid(logits.astype(jnp.float32)), 1e-4, 1.0 - 1e-4)
    gt = gt.astype(jnp.float32)
    pred = jnp.broadcast_to(pred[:, None], gt.shape)
    pos = (gt == 1.0).astype(jnp.float32)
    neg = (gt < 1.0).astype(jnp.float32)
    nw = (1.0 - gt) ** 4
    pos_loss = jnp.sum(jnp.log(pred) * (1 - pred) ** 2 * pos, axis=(2, 3, 4))
    neg_loss = jnp.sum(jnp.log(1 - pred) * pred ** 2 * nw * neg, axis=(2, 3, 4))
    num_pos = jnp.sum(pos, axis=(2, 3, 4))
    zero = (num_pos == 0).astype(jnp.float32)
    return -neg_loss * zero - (pos_loss + neg_loss) / (num_pos + zero) * (1 - zero)


def _ref_reg(output_nchw, mask, ind, target, *, mask_has_dim):
    B, D, H, W = output_nchw.shape
    ns, K = ind.shape[1], ind.shape[2]
    feat = jnp.transpose(output_nchw.astype(jnp.float32), (0, 2, 3, 1)).reshape(B, H * W, D)
    idx = jnp.broadcast_to(ind.reshape(B, ns * K)[:, :, None], (B, ns * K, D))
    pred = jnp.take_along_axis(feat, idx, axis=1).reshape(B, ns, K, D)
    if mask_has_dim:
        m = mask.astype(jnp.float32)
    else:
        m = jnp.broadcast_to(mask.astype(jnp.float32)[..., None], pred.shape)
    t = target.astype(jnp.float32)
    num = jnp.sum(jnp.abs(t * m - pred * m), axis=(2, 3))
    den = jnp.sum(m, axis=(2, 3))
    return num / (den + 1e-4)


def object_pose_loss_ref(outputs, batch, cfg, phase="train"):
    B, ns, K = batch["ind"].shape
    zero = jnp.zeros((B, ns), jnp.float32)
    c = {k: zero for k in ("hm", "wh", "hp", "off", "hm_hp", "hp_off", "scale")}
    for s in range(cfg.num_stacks):
        out = outputs[s]
        c["hm"] = c["hm"] + _ref_focal(out["hm"], batch["hm"]) / cfg.num_stacks
        c["hp"] = c["hp"] + _ref_reg(out["hps"], batch["hps_mask"], batch["ind"],
                                     batch["hps"], mask_has_dim=True) / cfg.num_stacks
        if cfg.reg_bbox and cfg.wh_weight > 0:
            c["wh"] = c["wh"] + _ref_reg(out["wh"], batch["reg_mask"], batch["ind"],
                                         batch["wh"], mask_has_dim=False) / cfg.num_stacks
        if cfg.obj_scale and cfg.obj_scale_weight > 0:
            c["scale"] = c["scale"] + _ref_reg(out["scale"], batch["reg_mask"], batch["ind"],
                                               batch["scale"], mask_has_dim=False) / cfg.num_stacks
        if cfg.reg_offset and cfg.off_weight > 0:
            c["off"] = c["off"] + _ref_reg(out["reg"], batch["reg_mask"], batch["ind"],
                                           batch["reg"], mask_has_dim=False) / cfg.num_stacks
        if cfg.reg_hp_offset and cfg.off_weight > 0:
            c["hp_off"] = c["hp_off"] + _ref_reg(out["hp_offset"], batch["hp_mask"], batch["hp_ind"],
                                                 batch["hp_offset"], mask_has_dim=False) / cfg.num_stacks
        if cfg.hm_hp and cfg.hm_hp_weight > 0:
            c["hm_hp"] = c["hm_hp"] + _ref_focal(out["hm_hp"], batch["hm_hp"]) / cfg.num_stacks
    return _combine(c, batch, cfg)


# --------------------------------------------------------------------------
if __name__ == "__main__":
    key = jax.random.PRNGKey(0)
    B, ns, C, J, H, W, K = 2, 4, 1, 8, 16, 16, 8   # batch, symmetries, classes, joints, spatial, max_objs
    ks = jax.random.split(key, 20)

    outputs = [{
        "hm": jax.random.normal(ks[0], (B, C, H, W), jnp.float32),
        "hm_hp": jax.random.normal(ks[1], (B, J, H, W), jnp.float32),
        "hps": jax.random.normal(ks[2], (B, 2 * J, H, W), jnp.float32),
        "wh": jax.random.normal(ks[3], (B, 2, H, W), jnp.float32),
        "reg": jax.random.normal(ks[4], (B, 2, H, W), jnp.float32),
        "hp_offset": jax.random.normal(ks[5], (B, 2, H, W), jnp.float32),
        "scale": jax.random.normal(ks[6], (B, 3, H, W), jnp.float32),
    }]

    hm_gt = jax.random.uniform(ks[7], (B, ns, C, H, W), jnp.float32, 0.0, 0.95)
    hm_gt = hm_gt.at[:, :, :, 4, 5].set(1.0)                       # positives in every symmetry
    hm_hp_gt = jax.random.uniform(ks[8], (B, ns, J, H, W), jnp.float32, 0.0, 0.95)
    hm_hp_gt = hm_hp_gt.at[:, 0, :, 7, 9].set(1.0)                 # num_pos==0 branch for other symmetries

    batch = {
        "hm": hm_gt,
        "hm_hp": hm_hp_gt,
        "ind": jax.random.randint(ks[9], (B, ns, K), 0, H * W, jnp.int32),
        "hps_mask": (jax.random.uniform(ks[10], (B, ns, K, 2 * J)) < 0.7).astype(jnp.float32),
        "hps": jax.random.normal(ks[11], (B, ns, K, 2 * J), jnp.float32),
        "reg_mask": (jax.random.uniform(ks[12], (B, ns, K)) < 0.8).astype(jnp.float32),
        "wh": jax.random.normal(ks[13], (B, ns, K, 2), jnp.float32),
        "scale": jax.random.normal(ks[14], (B, ns, K, 3), jnp.float32),
        "reg": jax.random.normal(ks[15], (B, ns, K, 2), jnp.float32),
        "hp_ind": jax.random.randint(ks[16], (B, ns, K * J), 0, H * W, jnp.int32),
        "hp_mask": (jax.random.uniform(ks[17], (B, ns, K * J)) < 0.7).astype(jnp.float32),
        "hp_offset": jax.random.normal(ks[18], (B, ns, K * J, 2), jnp.float32),
    }

    cfg = SimpleNamespace(
        num_stacks=1, hm_hp=True, mse_loss=False, dense_hp=False,
        hps_uncertainty=False, reg_bbox=True, wh_weight=0.1,
        obj_scale=True, obj_scale_weight=1.0, obj_scale_uncertainty=False,
        use_residual=False, dimension_ref=None, reg_offset=True, off_weight=1.0,
        reg_hp_offset=True, hm_hp_weight=1.0, hm_weight=1.0, hp_weight=1.0,
    )

    loss = object_pose_loss(outputs, batch, cfg, phase="train")
    loss = jax.block_until_ready(loss)
    loss_ref = object_pose_loss_ref(outputs, batch, cfg, phase="train")

    assert bool(jnp.isfinite(loss)), f"non-finite loss: {loss}"
    assert jnp.allclose(loss, loss_ref, rtol=5e-3, atol=5e-3), (loss, loss_ref)
    print("KERNEL_OK")
</pallas_src>

<mosaic_0001>
module attributes {stable_mosaic.version = 11 : i64} {
  func.func @kernel(%arg0: i32, %arg1: memref<1x2x128xf32, #tpu.memory_space<vmem>>, %arg2: memref<1x16x128xf32, #tpu.memory_space<vmem>>, %arg3: memref<1x4x2x128xf32, #tpu.memory_space<vmem>>, %arg4: memref<1x4x16x128xf32, #tpu.memory_space<vmem>>, %arg5: memref<2x4xf32, #tpu.memory_space<smem>>, %arg6: memref<2x4xf32, #tpu.memory_space<smem>>) attributes {dimension_semantics = [#tpu.dimension_semantics<arbitrary>], iteration_bounds = array<i64: 2>, scalar_prefetch = 0 : i64, scratch_operands = 0 : i64, tpu.core_type = #tpu.core_type<tc>, window_params = [{transform_indices = @transform_0, window_bounds = array<i64: 1, 2, 128>}, {transform_indices = @transform_1, window_bounds = array<i64: 1, 16, 128>}, {transform_indices = @transform_2, window_bounds = array<i64: 1, 4, 2, 128>}, {transform_indices = @transform_3, window_bounds = array<i64: 1, 4, 16, 128>}, {transform_indices = @transform_4, window_bounds = array<i64: 2, 4>}, {transform_indices = @transform_5, window_bounds = array<i64: 2, 4>}]} {
    %c0 = arith.constant 0 : index
    %c0_0 = arith.constant 0 : index
    %c0_1 = arith.constant 0 : index
    %0 = vector.load %arg1[%c0, %c0_0, %c0_1] : memref<1x2x128xf32, #tpu.memory_space<vmem>>, vector<1x2x128xf32>
    %1 = vector.shape_cast %0 : vector<1x2x128xf32> to vector<2x128xf32>
    %2 = arith.negf %1 : vector<2x128xf32>
    %3 = math.exp %2 : vector<2x128xf32>
    %cst = arith.constant 1.000000e+00 : f32
    %4 = vector.broadcast %cst : f32 to vector<2x128xf32>
    %5 = arith.addf %4, %3 : vector<2x128xf32>
    %6 = arith.divf %4, %5 : vector<2x128xf32>
    %cst_2 = arith.constant 9.99999974E-5 : f32
    %cst_3 = arith.constant 0.999899983 : f32
    %7 = vector.broadcast %cst_2 : f32 to vector<2x128xf32>
    %8 = arith.maximumf %7, %6 : vector<2x128xf32>
    %9 = vector.broadcast %cst_3 : f32 to vector<2x128xf32>
    %10 = arith.minimumf %9, %8 : vector<2x128xf32>
    %11 = math.log %10 : vector<2x128xf32>
    %cst_4 = arith.constant 1.000000e+00 : f32
    %12 = vector.broadcast %cst_4 : f32 to vector<2x128xf32>
    %13 = arith.subf %12, %10 : vector<2x128xf32>
    %14 = math.log %13 : vector<2x128xf32>
    %cst_5 = arith.constant 1.000000e+00 : f32
    %15 = vector.broadcast %cst_5 : f32 to vector<2x128xf32>
    %16 = arith.subf %15, %10 : vector<2x128xf32>
    %17 = arith.mulf %16, %16 : vector<2x128xf32>
    %18 = arith.mulf %10, %10 : vector<2x128xf32>
    %c0_6 = arith.constant 0 : index
    %c0_7 = arith.constant 0 : index
    %c0_8 = arith.constant 0 : index
    %c0_9 = arith.constant 0 : index
    %19 = vector.load %arg3[%c0_6, %c0_7, %c0_8, %c0_9] : memref<1x4x2x128xf32, #tpu.memory_space<vmem>>, vector<1x1x2x128xf32>
    %20 = vector.shape_cast %19 : vector<1x1x2x128xf32> to vector<2x128xf32>
    %cst_10 = arith.constant 1.000000e+00 : f32
    %21 = vector.broadcast %cst_10 : f32 to vector<2x128xf32>
    %22 = arith.cmpf oeq, %20, %21 : vector<2x128xf32>
    %23 = arith.extui %22 : vector<2x128xi1> to vector<2x128xi32>
    %24 = arith.sitofp %23 : vector<2x128xi32> to vector<2x128xf32>
    %cst_11 = arith.constant 1.000000e+00 : f32
    %25 = vector.broadcast %cst_11 : f32 to vector<2x128xf32>
    %26 = arith.cmpf olt, %20, %25 : vector<2x128xf32>
    %27 = arith.extui %26 : vector<2x128xi1> to vector<2x128xi32>
    %28 = arith.sitofp %27 : vector<2x128xi32> to vector<2x128xf32>
    %cst_12 = arith.constant 1.000000e+00 : f32
    %29 = vector.broadcast %cst_12 : f32 to vector<2x128xf32>
    %30 = arith.subf %29, %20 : vector<2x128xf32>
    %31 = arith.mulf %30, %30 : vector<2x128xf32>
    %32 = arith.mulf %31, %31 : vector<2x128xf32>
    %33 = arith.mulf %11, %17 : vector<2x128xf32>
    %34 = arith.mulf %33, %24 : vector<2x128xf32>
    %35 = vector.shape_cast %34 : vector<2x128xf32> to vector<1x2x128xf32>
    %cst_13 = arith.constant dense<0.000000e+00> : vector<1xf32>
    %36 = vector.multi_reduction <add>, %35, %cst_13 [1, 2] : vector<1x2x128xf32> to vector<1xf32>
    %37 = vector.shape_cast %36 : vector<1xf32> to vector<1x1x1xf32>
    %38 = vector.extract %37[0, 0, 0] : f32 from vector<1x1x1xf32>
    %39 = arith.mulf %14, %18 : vector<2x128xf32>
    %40 = arith.mulf %39, %32 : vector<2x128xf32>
    %41 = arith.mulf %40, %28 : vector<2x128xf32>
    %42 = vector.shape_cast %41 : vector<2x128xf32> to vector<1x2x128xf32>
    %cst_14 = arith.constant dense<0.000000e+00> : vector<1xf32>
    %43 = vector.multi_reduction <add>, %42, %cst_14 [1, 2] : vector<1x2x128xf32> to vector<1xf32>
    %44 = vector.shape_cast %43 : vector<1xf32> to vector<1x1x1xf32>
    %45 = vector.extract %44[0, 0, 0] : f32 from vector<1x1x1xf32>
    %46 = vector.shape_cast %24 : vector<2x128xf32> to vector<1x2x128xf32>
    %cst_15 = arith.constant dense<0.000000e+00> : vector<1xf32>
    %47 = vector.multi_reduction <add>, %46, %cst_15 [1, 2] : vector<1x2x128xf32> to vector<1xf32>
    %48 = vector.shape_cast %47 : vector<1xf32> to vector<1x1x1xf32>
    %49 = vector.extract %48[0, 0, 0] : f32 from vector<1x1x1xf32>
    %cst_16 = arith.constant 0.000000e+00 : f32
    %50 = arith.cmpf oeq, %49, %cst_16 : f32
    %51 = arith.extui %50 : i1 to i32
    %52 = arith.sitofp %51 : i32 to f32
    %cst_17 = arith.constant 0.000000e+00 : f32
    %53 = arith.subf %cst_17, %45 : f32
    %54 = arith.mulf %53, %52 : f32
    %55 = arith.addf %38, %45 : f32
    %56 = arith.addf %49, %52 : f32
    %57 = arith.divf %55, %56 : f32
    %cst_18 = arith.constant 1.000000e+00 : f32
    %58 = arith.subf %cst_18, %52 : f32
    %59 = arith.mulf %57, %58 : f32
    %60 = arith.subf %54, %59 : f32
    %61 = arith.index_cast %arg0 : i32 to index
    %c0_19 = arith.constant 0 : index
    %62 = memref.load %arg5[%61, %c0_19] : memref<2x4xf32, #tpu.memory_space<smem>>
    memref.store %60, %arg5[%61, %c0_19] : memref<2x4xf32, #tpu.memory_space<smem>>
    %c0_20 = arith.constant 0 : index
    %c1 = arith.constant 1 : index
    %c0_21 = arith.constant 0 : index
    %c0_22 = arith.constant 0 : index
    %63 = vector.load %arg3[%c0_20, %c1, %c0_21, %c0_22] : memref<1x4x2x128xf32, #tpu.memory_space<vmem>>, vector<1x1x2x128xf32>
    %64 = vector.shape_cast %63 : vector<1x1x2x128xf32> to vector<2x128xf32>
    %cst_23 = arith.constant 1.000000e+00 : f32
    %65 = vector.broadcast %cst_23 : f32 to vector<2x128xf32>
    %66 = arith.cmpf oeq, %64, %65 : vector<2x128xf32>
    %67 = arith.extui %66 : vector<2x128xi1> to vector<2x128xi32>
    %68 = arith.sitofp %67 : vector<2x128xi32> to vector<2x128xf32>
    %cst_24 = arith.constant 1.000000e+00 : f32
    %69 = vector.broadcast %cst_24 : f32 to vector<2x128xf32>
    %70 = arith.cmpf olt, %64, %69 : vector<2x128xf32>
    %71 = arith.extui %70 : vector<2x128xi1> to vector<2x128xi32>
    %72 = arith.sitofp %71 : vector<2x128xi32> to vector<2x128xf32>
    %cst_25 = arith.constant 1.000000e+00 : f32
    %73 = vector.broadcast %cst_25 : f32 to vector<2x128xf32>
    %74 = arith.subf %73, %64 : vector<2x128xf32>
    %75 = arith.mulf %74, %74 : vector<2x128xf32>
    %76 = arith.mulf %75, %75 : vector<2x128xf32>
    %77 = arith.mulf %11, %17 : vector<2x128xf32>
    %78 = arith.mulf %77, %68 : vector<2x128xf32>
    %79 = vector.shape_cast %78 : vector<2x128xf32> to vector<1x2x128xf32>
    %cst_26 = arith.constant dense<0.000000e+00> : vector<1xf32>
    %80 = vector.multi_reduction <add>, %79, %cst_26 [1, 2] : vector<1x2x128xf32> to vector<1xf32>
    %81 = vector.shape_cast %80 : vector<1xf32> to vector<1x1x1xf32>
    %82 = vector.extract %81[0, 0, 0] : f32 from vector<1x1x1xf32>
    %83 = arith.mulf %14, %18 : vector<2x128xf32>
    %84 = arith.mulf %83, %76 : vector<2x128xf32>
    %85 = arith.mulf %84, %72 : vector<2x128xf32>
    %86 = vector.shape_cast %85 : vector<2x128xf32> to vector<1x2x128xf32>
    %cst_27 = arith.constant dense<0.000000e+00> : vector<1xf32>
    %87 = vector.multi_reduction <add>, %86, %cst_27 [1, 2] : vector<1x2x128xf32> to vector<1xf32>
    %88 = vector.shape_cast %87 : vector<1xf32> to vector<1x1x1xf32>
    %89 = vector.extract %88[0, 0, 0] : f32 from vector<1x1x1xf32>
    %90 = vector.shape_cast %68 : vector<2x128xf32> to vector<1x2x128xf32>
    %cst_28 = arith.constant dense<0.000000e+00> : vector<1xf32>
    %91 = vector.multi_reduction <add>, %90, %cst_28 [1, 2] : vector<1x2x128xf32> to vector<1xf32>
    %92 = vector.shape_cast %91 : vector<1xf32> to vector<1x1x1xf32>
    %93 = vector.extract %92[0, 0, 0] : f32 from vector<1x1x1xf32>
    %cst_29 = arith.constant 0.000000e+00 : f32
    %94 = arith.cmpf oeq, %93, %cst_29 : f32
    %95 = arith.extui %94 : i1 to i32
    %96 = arith.sitofp %95 : i32 to f32
    %cst_30 = arith.constant 0.000000e+00 : f32
    %97 = arith.subf %cst_30, %89 : f32
    %98 = arith.mulf %97, %96 : f32
    %99 = arith.addf %82, %89 : f32
    %100 = arith.addf %93, %96 : f32
    %101 = arith.divf %99, %100 : f32
    %cst_31 = arith.constant 1.000000e+00 : f32
    %102 = arith.subf %cst_31, %96 : f32
    %103 = arith.mulf %101, %102 : f32
    %104 = arith.subf %98, %103 : f32
    %105 = arith.index_cast %arg0 : i32 to index
    %c1_32 = arith.constant 1 : index
    %106 = memref.load %arg5[%105, %c1_32] : memref<2x4xf32, #tpu.memory_space<smem>>
    memref.store %104, %arg5[%105, %c1_32] : memref<2x4xf32, #tpu.memory_space<smem>>
    %c0_33 = arith.constant 0 : index
    %c2 = arith.constant 2 : index
    %c0_34 = arith.constant 0 : index
    %c0_35 = arith.constant 0 : index
    %107 = vector.load %arg3[%c0_33, %c2, %c0_34, %c0_35] : memref<1x4x2x128xf32, #tpu.memory_space<vmem>>, vector<1x1x2x128xf32>
    %108 = vector.shape_cast %107 : vector<1x1x2x128xf32> to vector<2x128xf32>
    %cst_36 = arith.constant 1.000000e+00 : f32
    %109 = vector.broadcast %cst_36 : f32 to vector<2x128xf32>
    %110 = arith.cmpf oeq, %108, %109 : vector<2x128xf32>
    %111 = arith.extui %110 : vector<2x128xi1> to vector<2x128xi32>
    %112 = arith.sitofp %111 : vector<2x128xi32> to vector<2x128xf32>
    %cst_37 = arith.constant 1.000000e+00 : f32
    %113 = vector.broadcast %cst_37 : f32 to vector<2x128xf32>
    %114 = arith.cmpf olt, %108, %113 : vector<2x128xf32>
    %115 = arith.extui %114 : vector<2x128xi1> to vector<2x128xi32>
    %116 = arith.sitofp %115 : vector<2x128xi32> to vector<2x128xf32>
    %cst_38 = arith.constant 1.000000e+00 : f32
    %117 = vector.broadcast %cst_38 : f32 to vector<2x128xf32>
    %118 = arith.subf %117, %108 : vector<2x128xf32>
    %119 = arith.mulf %118, %118 : vector<2x128xf32>
    %120 = arith.mulf %119, %119 : vector<2x128xf32>
    %121 = arith.mulf %11, %17 : vector<2x128xf32>
    %122 = arith.mulf %121, %112 : vector<2x128xf32>
    %123 = vector.shape_cast %122 : vector<2x128xf32> to vector<1x2x128xf32>
    %cst_39 = arith.constant dense<0.000000e+00> : vector<1xf32>
    %124 = vector.multi_reduction <add>, %123, %cst_39 [1, 2] : vector<1x2x128xf32> to vector<1xf32>
    %125 = vector.shape_cast %124 : vector<1xf32> to vector<1x1x1xf32>
    %126 = vector.extract %125[0, 0, 0] : f32 from vector<1x1x1xf32>
    %127 = arith.mulf %14, %18 : vector<2x128xf32>
    %128 = arith.mulf %127, %120 : vector<2x128xf32>
    %129 = arith.mulf %128, %116 : vector<2x128xf32>
    %130 = vector.shape_cast %129 : vector<2x128xf32> to vector<1x2x128xf32>
    %cst_40 = arith.constant dense<0.000000e+00> : vector<1xf32>
    %131 = vector.multi_reduction <add>, %130, %cst_40 [1, 2] : vector<1x2x128xf32> to vector<1xf32>
    %132 = vector.shape_cast %131 : vector<1xf32> to vector<1x1x1xf32>
    %133 = vector.extract %132[0, 0, 0] : f32 from vector<1x1x1xf32>
    %134 = vector.shape_cast %112 : vector<2x128xf32> to vector<1x2x128xf32>
    %cst_41 = arith.constant dense<0.000000e+00> : vector<1xf32>
    %135 = vector.multi_reduction <add>, %134, %cst_41 [1, 2] : vector<1x2x128xf32> to vector<1xf32>
    %136 = vector.shape_cast %135 : vector<1xf32> to vector<1x1x1xf32>
    %137 = vector.extract %136[0, 0, 0] : f32 from vector<1x1x1xf32>
    %cst_42 = arith.constant 0.000000e+00 : f32
    %138 = arith.cmpf oeq, %137, %cst_42 : f32
    %139 = arith.extui %138 : i1 to i32
    %140 = arith.sitofp %139 : i32 to f32
    %cst_43 = arith.constant 0.000000e+00 : f32
    %141 = arith.subf %cst_43, %133 : f32
    %142 = arith.mulf %141, %140 : f32
    %143 = arith.addf %126, %133 : f32
    %144 = arith.addf %137, %140 : f32
    %145 = arith.divf %143, %144 : f32
    %cst_44 = arith.constant 1.000000e+00 : f32
    %146 = arith.subf %cst_44, %140 : f32
    %147 = arith.mulf %145, %146 : f32
    %148 = arith.subf %142, %147 : f32
    %149 = arith.index_cast %arg0 : i32 to index
    %c2_45 = arith.constant 2 : index
    %150 = memref.load %arg5[%149, %c2_45] : memref<2x4xf32, #tpu.memory_space<smem>>
    memref.store %148, %arg5[%149, %c2_45] : memref<2x4xf32, #tpu.memory_space<smem>>
    %c0_46 = arith.constant 0 : index
    %c3 = arith.constant 3 : index
    %c0_47 = arith.constant 0 : index
    %c0_48 = arith.constant 0 : index
    %151 = vector.load %arg3[%c0_46, %c3, %c0_47, %c0_48] : memref<1x4x2x128xf32, #tpu.memory_space<vmem>>, vector<1x1x2x128xf32>
    %152 = vector.shape_cast %151 : vector<1x1x2x128xf32> to vector<2x128xf32>
    %cst_49 = arith.constant 1.000000e+00 : f32
    %153 = vector.broadcast %cst_49 : f32 to vector<2x128xf32>
    %154 = arith.cmpf oeq, %152, %153 : vector<2x128xf32>
    %155 = arith.extui %154 : vector<2x128xi1> to vector<2x128xi32>
    %156 = arith.sitofp %155 : vector<2x128xi32> to vector<2x128xf32>
    %cst_50 = arith.constant 1.000000e+00 : f32
    %157 = vector.broadcast %cst_50 : f32 to vector<2x128xf32>
    %158 = arith.cmpf olt, %152, %157 : vector<2x128xf32>
    %159 = arith.extui %158 : vector<2x128xi1> to vector<2x128xi32>
    %160 = arith.sitofp %159 : vector<2x128xi32> to vector<2x128xf32>
    %cst_51 = arith.constant 1.000000e+00 : f32
    %161 = vector.broadcast %cst_51 : f32 to vector<2x128xf32>
    %162 = arith.subf %161, %152 : vector<2x128xf32>
    %163 = arith.mulf %162, %162 : vector<2x128xf32>
    %164 = arith.mulf %163, %163 : vector<2x128xf32>
    %165 = arith.mulf %11, %17 : vector<2x128xf32>
    %166 = arith.mulf %165, %156 : vector<2x128xf32>
    %167 = vector.shape_cast %166 : vector<2x128xf32> to vector<1x2x128xf32>
    %cst_52 = arith.constant dense<0.000000e+00> : vector<1xf32>
    %168 = vector.multi_reduction <add>, %167, %cst_52 [1, 2] : vector<1x2x128xf32> to vector<1xf32>
    %169 = vector.shape_cast %168 : vector<1xf32> to vector<1x1x1xf32>
    %170 = vector.extract %169[0, 0, 0] : f32 from vector<1x1x1xf32>
    %171 = arith.mulf %14, %18 : vector<2x128xf32>
    %172 = arith.mulf %171, %164 : vector<2x128xf32>
    %173 = arith.mulf %172, %160 : vector<2x128xf32>
    %174 = vector.shape_cast %173 : vector<2x128xf32> to vector<1x2x128xf32>
    %cst_53 = arith.constant dense<0.000000e+00> : vector<1xf32>
    %175 = vector.multi_reduction <add>, %174, %cst_53 [1, 2] : vector<1x2x128xf32> to vector<1xf32>
    %176 = vector.shape_cast %175 : vector<1xf32> to vector<1x1x1xf32>
    %177 = vector.extract %176[0, 0, 0] : f32 from vector<1x1x1xf32>
    %178 = vector.shape_cast %156 : vector<2x128xf32> to vector<1x2x128xf32>
    %cst_54 = arith.constant dense<0.000000e+00> : vector<1xf32>
    %179 = vector.multi_reduction <add>, %178, %cst_54 [1, 2] : vector<1x2x128xf32> to vector<1xf32>
    %180 = vector.shape_cast %179 : vector<1xf32> to vector<1x1x1xf32>
    %181 = vector.extract %180[0, 0, 0] : f32 from vector<1x1x1xf32>
    %cst_55 = arith.constant 0.000000e+00 : f32
    %182 = arith.cmpf oeq, %181, %cst_55 : f32
    %183 = arith.extui %182 : i1 to i32
    %184 = arith.sitofp %183 : i32 to f32
    %cst_56 = arith.constant 0.000000e+00 : f32
    %185 = arith.subf %cst_56, %177 : f32
    %186 = arith.mulf %185, %184 : f32
    %187 = arith.addf %170, %177 : f32
    %188 = arith.addf %181, %184 : f32
    %189 = arith.divf %187, %188 : f32
    %cst_57 = arith.constant 1.000000e+00 : f32
    %190 = arith.subf %cst_57, %184 : f32
    %191 = arith.mulf %189, %190 : f32
    %192 = arith.subf %186, %191 : f32
    %193 = arith.index_cast %arg0 : i32 to index
    %c3_58 = arith.constant 3 : index
    %194 = memref.load %arg5[%193, %c3_58] : memref<2x4xf32, #tpu.memory_space<smem>>
    memref.store %192, %arg5[%193, %c3_58] : memref<2x4xf32, #tpu.memory_space<smem>>
    %c0_59 = arith.constant 0 : index
    %c0_60 = arith.constant 0 : index
    %c0_61 = arith.constant 0 : index
    %195 = vector.load %arg2[%c0_59, %c0_60, %c0_61] : memref<1x16x128xf32, #tpu.memory_space<vmem>>, vector<1x16x128xf32>
    %196 = vector.shape_cast %195 : vector<1x16x128xf32> to vector<16x128xf32>
    %197 = arith.negf %196 : vector<16x128xf32>
    %198 = math.exp %197 : vector<16x128xf32>
    %cst_62 = arith.constant 1.000000e+00 : f32
    %199 = vector.broadcast %cst_62 : f32 to vector<16x128xf32>
    %200 = arith.addf %199, %198 : vector<16x128xf32>
    %201 = arith.divf %199, %200 : vector<16x128xf32>
    %cst_63 = arith.constant 9.99999974E-5 : f32
    %cst_64 = arith.constant 0.999899983 : f32
    %202 = vector.broadcast %cst_63 : f32 to vector<16x128xf32>
    %203 = arith.maximumf %202, %201 : vector<16x128xf32>
    %204 = vector.broadcast %cst_64 : f32 to vector<16x128xf32>
    %205 = arith.minimumf %204, %203 : vector<16x128xf32>
    %206 = math.log %205 : vector<16x128xf32>
    %cst_65 = arith.constant 1.000000e+00 : f32
    %207 = vector.broadcast %cst_65 : f32 to vector<16x128xf32>
    %208 = arith.subf %207, %205 : vector<16x128xf32>
    %209 = math.log %208 : vector<16x128xf32>
    %cst_66 = arith.constant 1.000000e+00 : f32
    %210 = vector.broadcast %cst_66 : f32 to vector<16x128xf32>
    %211 = arith.subf %210, %205 : vector<16x128xf32>
    %212 = arith.mulf %211, %211 : vector<16x128xf32>
    %213 = arith.mulf %205, %205 : vector<16x128xf32>
    %c0_67 = arith.constant 0 : index
    %c0_68 = arith.constant 0 : index
    %c0_69 = arith.constant 0 : index
    %c0_70 = arith.constant 0 : index
    %214 = vector.load %arg4[%c0_67, %c0_68, %c0_69, %c0_70] : memref<1x4x16x128xf32, #tpu.memory_space<vmem>>, vector<1x1x16x128xf32>
    %215 = vector.shape_cast %214 : vector<1x1x16x128xf32> to vector<16x128xf32>
    %cst_71 = arith.constant 1.000000e+00 : f32
    %216 = vector.broadcast %cst_71 : f32 to vector<16x128xf32>
    %217 = arith.cmpf oeq, %215, %216 : vector<16x128xf32>
    %218 = arith.extui %217 : vector<16x128xi1> to vector<16x128xi32>
    %219 = arith.sitofp %218 : vector<16x128xi32> to vector<16x128xf32>
    %cst_72 = arith.constant 1.000000e+00 : f32
    %220 = vector.broadcast %cst_72 : f32 to vector<16x128xf32>
    %221 = arith.cmpf olt, %215, %220 : vector<16x128xf32>
    %222 = arith.extui %221 : vector<16x128xi1> to vector<16x128xi32>
    %223 = arith.sitofp %222 : vector<16x128xi32> to vector<16x128xf32>
    %cst_73 = arith.constant 1.000000e+00 : f32
    %224 = vector.broadcast %cst_73 : f32 to vector<16x128xf32>
    %225 = arith.subf %224, %215 : vector<16x128xf32>
    %226 = arith.mulf %225, %225 : vector<16x128xf32>
    %227 = arith.mulf %226, %226 : vector<16x128xf32>
    %228 = arith.mulf %206, %212 : vector<16x128xf32>
    %229 = arith.mulf %228, %219 : vector<16x128xf32>
    %230 = vector.shape_cast %229 : vector<16x128xf32> to vector<1x16x128xf32>
    %cst_74 = arith.constant dense<0.000000e+00> : vector<1xf32>
    %231 = vector.multi_reduction <add>, %230, %cst_74 [1, 2] : vector<1x16x128xf32> to vector<1xf32>
    %232 = vector.shape_cast %231 : vector<1xf32> to vector<1x1x1xf32>
    %233 = vector.extract %232[0, 0, 0] : f32 from vector<1x1x1xf32>
    %234 = arith.mulf %209, %213 : vector<16x128xf32>
    %235 = arith.mulf %234, %227 : vector<16x128xf32>
    %236 = arith.mulf %235, %223 : vector<16x128xf32>
    %237 = vector.shape_cast %236 : vector<16x128xf32> to vector<1x16x128xf32>
    %cst_75 = arith.constant dense<0.000000e+00> : vector<1xf32>
    %238 = vector.multi_reduction <add>, %237, %cst_75 [1, 2] : vector<1x16x128xf32> to vector<1xf32>
    %239 = vector.shape_cast %238 : vector<1xf32> to vector<1x1x1xf32>
    %240 = vector.extract %239[0, 0, 0] : f32 from vector<1x1x1xf32>
    %241 = vector.shape_cast %219 : vector<16x128xf32> to vector<1x16x128xf32>
    %cst_76 = arith.constant dense<0.000000e+00> : vector<1xf32>
    %242 = vector.multi_reduction <add>, %241, %cst_76 [1, 2] : vector<1x16x128xf32> to vector<1xf32>
    %243 = vector.shape_cast %242 : vector<1xf32> to vector<1x1x1xf32>
    %244 = vector.extract %243[0, 0, 0] : f32 from vector<1x1x1xf32>
    %cst_77 = arith.constant 0.000000e+00 : f32
    %245 = arith.cmpf oeq, %244, %cst_77 : f32
    %246 = arith.extui %245 : i1 to i32
    %247 = arith.sitofp %246 : i32 to f32
    %cst_78 = arith.constant 0.000000e+00 : f32
    %248 = arith.subf %cst_78, %240 : f32
    %249 = arith.mulf %248, %247 : f32
    %250 = arith.addf %233, %240 : f32
    %251 = arith.addf %244, %247 : f32
    %252 = arith.divf %250, %251 : f32
    %cst_79 = arith.constant 1.000000e+00 : f32
    %253 = arith.subf %cst_79, %247 : f32
    %254 = arith.mulf %252, %253 : f32
    %255 = arith.subf %249, %254 : f32
    %256 = arith.index_cast %arg0 : i32 to index
    %c0_80 = arith.constant 0 : index
    %257 = memref.load %arg6[%256, %c0_80] : memref<2x4xf32, #tpu.memory_space<smem>>
    memref.store %255, %arg6[%256, %c0_80] : memref<2x4xf32, #tpu.memory_space<smem>>
    %c0_81 = arith.constant 0 : index
    %c1_82 = arith.constant 1 : index
    %c0_83 = arith.constant 0 : index
    %c0_84 = arith.constant 0 : index
    %258 = vector.load %arg4[%c0_81, %c1_82, %c0_83, %c0_84] : memref<1x4x16x128xf32, #tpu.memory_space<vmem>>, vector<1x1x16x128xf32>
    %259 = vector.shape_cast %258 : vector<1x1x16x128xf32> to vector<16x128xf32>
    %cst_85 = arith.constant 1.000000e+00 : f32
    %260 = vector.broadcast %cst_85 : f32 to vector<16x128xf32>
    %261 = arith.cmpf oeq, %259, %260 : vector<16x128xf32>
    %262 = arith.extui %261 : vector<16x128xi1> to vector<16x128xi32>
    %263 = arith.sitofp %262 : vector<16x128xi32> to vector<16x128xf32>
    %cst_86 = arith.constant 1.000000e+00 : f32
    %264 = vector.broadcast %cst_86 : f32 to vector<16x128xf32>
    %265 = arith.cmpf olt, %259, %264 : vector<16x128xf32>
    %266 = arith.extui %265 : vector<16x128xi1> to vector<16x128xi32>
    %267 = arith.sitofp %266 : vector<16x128xi32> to vector<16x128xf32>
    %cst_87 = arith.constant 1.000000e+00 : f32
    %268 = vector.broadcast %cst_87 : f32 to vector<16x128xf32>
    %269 = arith.subf %268, %259 : vector<16x128xf32>
    %270 = arith.mulf %269, %269 : vector<16x128xf32>
    %271 = arith.mulf %270, %270 : vector<16x128xf32>
    %272 = arith.mulf %206, %212 : vector<16x128xf32>
    %273 = arith.mulf %272, %263 : vector<16x128xf32>
    %274 = vector.shape_cast %273 : vector<16x128xf32> to vector<1x16x128xf32>
    %cst_88 = arith.constant dense<0.000000e+00> : vector<1xf32>
    %275 = vector.multi_reduction <add>, %274, %cst_88 [1, 2] : vector<1x16x128xf32> to vector<1xf32>
    %276 = vector.shape_cast %275 : vector<1xf32> to vector<1x1x1xf32>
    %277 = vector.extract %276[0, 0, 0] : f32 from vector<1x1x1xf32>
    %278 = arith.mulf %209, %213 : vector<16x128xf32>
    %279 = arith.mulf %278, %271 : vector<16x128xf32>
    %280 = arith.mulf %279, %267 : vector<16x128xf32>
    %281 = vector.shape_cast %280 : vector<16x128xf32> to vector<1x16x128xf32>
    %cst_89 = arith.constant dense<0.000000e+00> : vector<1xf32>
    %282 = vector.multi_reduction <add>, %281, %cst_89 [1, 2] : vector<1x16x128xf32> to vector<1xf32>
    %283 = vector.shape_cast %282 : vector<1xf32> to vector<1x1x1xf32>
    %284 = vector.extract %283[0, 0, 0] : f32 from vector<1x1x1xf32>
    %285 = vector.shape_cast %263 : vector<16x128xf32> to vector<1x16x128xf32>
    %cst_90 = arith.constant dense<0.000000e+00> : vector<1xf32>
    %286 = vector.multi_reduction <add>, %285, %cst_90 [1, 2] : vector<1x16x128xf32> to vector<1xf32>
    %287 = vector.shape_cast %286 : vector<1xf32> to vector<1x1x1xf32>
    %288 = vector.extract %287[0, 0, 0] : f32 from vector<1x1x1xf32>
    %cst_91 = arith.constant 0.000000e+00 : f32
    %289 = arith.cmpf oeq, %288, %cst_91 : f32
    %290 = arith.extui %289 : i1 to i32
    %291 = arith.sitofp %290 : i32 to f32
    %cst_92 = arith.constant 0.000000e+00 : f32
    %292 = arith.subf %cst_92, %284 : f32
    %293 = arith.mulf %292, %291 : f32
    %294 = arith.addf %277, %284 : f32
    %295 = arith.addf %288, %291 : f32
    %296 = arith.divf %294, %295 : f32
    %cst_93 = arith.constant 1.000000e+00 : f32
    %297 = arith.subf %cst_93, %291 : f32
    %298 = arith.mulf %296, %297 : f32
    %299 = arith.subf %293, %298 : f32
    %300 = arith.index_cast %arg0 : i32 to index
    %c1_94 = arith.constant 1 : index
    %301 = memref.load %arg6[%300, %c1_94] : memref<2x4xf32, #tpu.memory_space<smem>>
    memref.store %299, %arg6[%300, %c1_94] : memref<2x4xf32, #tpu.memory_space<smem>>
    %c0_95 = arith.constant 0 : index
    %c2_96 = arith.constant 2 : index
    %c0_97 = arith.constant 0 : index
    %c0_98 = arith.constant 0 : index
    %302 = vector.load %arg4[%c0_95, %c2_96, %c0_97, %c0_98] : memref<1x4x16x128xf32, #tpu.memory_space<vmem>>, vector<1x1x16x128xf32>
    %303 = vector.shape_cast %302 : vector<1x1x16x128xf32> to vector<16x128xf32>
    %cst_99 = arith.constant 1.000000e+00 : f32
    %304 = vector.broadcast %cst_99 : f32 to vector<16x128xf32>
    %305 = arith.cmpf oeq, %303, %304 : vector<16x128xf32>
    %306 = arith.extui %305 : vector<16x128xi1> to vector<16x128xi32>
    %307 = arith.sitofp %306 : vector<16x128xi32> to vector<16x128xf32>
    %cst_100 = arith.constant 1.000000e+00 : f32
    %308 = vector.broadcast %cst_100 : f32 to vector<16x128xf32>
    %309 = arith.cmpf olt, %303, %308 : vector<16x128xf32>
    %310 = arith.extui %309 : vector<16x128xi1> to vector<16x128xi32>
    %311 = arith.sitofp %310 : vector<16x128xi32> to vector<16x128xf32>
    %cst_101 = arith.constant 1.000000e+00 : f32
    %312 = vector.broadcast %cst_101 : f32 to vector<16x128xf32>
    %313 = arith.subf %312, %303 : vector<16x128xf32>
    %314 = arith.mulf %313, %313 : vector<16x128xf32>
    %315 = arith.mulf %314, %314 : vector<16x128xf32>
    %316 = arith.mulf %206, %212 : vector<16x128xf32>
    %317 = arith.mulf %316, %307 : vector<16x128xf32>
    %318 = vector.shape_cast %317 : vector<16x128xf32> to vector<1x16x128xf32>
    %cst_102 = arith.constant dense<0.000000e+00> : vector<1xf32>
    %319 = vector.multi_reduction <add>, %318, %cst_102 [1, 2] : vector<1x16x128xf32> to vector<1xf32>
    %320 = vector.shape_cast %319 : vector<1xf32> to vector<1x1x1xf32>
    %321 = vector.extract %320[0, 0, 0] : f32 from vector<1x1x1xf32>
    %322 = arith.mulf %209, %213 : vector<16x128xf32>
    %323 = arith.mulf %322, %315 : vector<16x128xf32>
    %324 = arith.mulf %323, %311 : vector<16x128xf32>
    %325 = vector.shape_cast %324 : vector<16x128xf32> to vector<1x16x128xf32>
    %cst_103 = arith.constant dense<0.000000e+00> : vector<1xf32>
    %326 = vector.multi_reduction <add>, %325, %cst_103 [1, 2] : vector<1x16x128xf32> to vector<1xf32>
    %327 = vector.shape_cast %326 : vector<1xf32> to vector<1x1x1xf32>
    %328 = vector.extract %327[0, 0, 0] : f32 from vector<1x1x1xf32>
    %329 = vector.shape_cast %307 : vector<16x128xf32> to vector<1x16x128xf32>
    %cst_104 = arith.constant dense<0.000000e+00> : vector<1xf32>
    %330 = vector.multi_reduction <add>, %329, %cst_104 [1, 2] : vector<1x16x128xf32> to vector<1xf32>
    %331 = vector.shape_cast %330 : vector<1xf32> to vector<1x1x1xf32>
    %332 = vector.extract %331[0, 0, 0] : f32 from vector<1x1x1xf32>
    %cst_105 = arith.constant 0.000000e+00 : f32
    %333 = arith.cmpf oeq, %332, %cst_105 : f32
    %334 = arith.extui %333 : i1 to i32
    %335 = arith.sitofp %334 : i32 to f32
    %cst_106 = arith.constant 0.000000e+00 : f32
    %336 = arith.subf %cst_106, %328 : f32
    %337 = arith.mulf %336, %335 : f32
    %338 = arith.addf %321, %328 : f32
    %339 = arith.addf %332, %335 : f32
    %340 = arith.divf %338, %339 : f32
    %cst_107 = arith.constant 1.000000e+00 : f32
    %341 = arith.subf %cst_107, %335 : f32
    %342 = arith.mulf %340, %341 : f32
    %343 = arith.subf %337, %342 : f32
    %344 = arith.index_cast %arg0 : i32 to index
    %c2_108 = arith.constant 2 : index
    %345 = memref.load %arg6[%344, %c2_108] : memref<2x4xf32, #tpu.memory_space<smem>>
    memref.store %343, %arg6[%344, %c2_108] : memref<2x4xf32, #tpu.memory_space<smem>>
    %c0_109 = arith.constant 0 : index
    %c3_110 = arith.constant 3 : index
    %c0_111 = arith.constant 0 : index
    %c0_112 = arith.constant 0 : index
    %346 = vector.load %arg4[%c0_109, %c3_110, %c0_111, %c0_112] : memref<1x4x16x128xf32, #tpu.memory_space<vmem>>, vector<1x1x16x128xf32>
    %347 = vector.shape_cast %346 : vector<1x1x16x128xf32> to vector<16x128xf32>
    %cst_113 = arith.constant 1.000000e+00 : f32
    %348 = vector.broadcast %cst_113 : f32 to vector<16x128xf32>
    %349 = arith.cmpf oeq, %347, %348 : vector<16x128xf32>
    %350 = arith.extui %349 : vector<16x128xi1> to vector<16x128xi32>
    %351 = arith.sitofp %350 : vector<16x128xi32> to vector<16x128xf32>
    %cst_114 = arith.constant 1.000000e+00 : f32
    %352 = vector.broadcast %cst_114 : f32 to vector<16x128xf32>
    %353 = arith.cmpf olt, %347, %352 : vector<16x128xf32>
    %354 = arith.extui %353 : vector<16x128xi1> to vector<16x128xi32>
    %355 = arith.sitofp %354 : vector<16x128xi32> to vector<16x128xf32>
    %cst_115 = arith.constant 1.000000e+00 : f32
    %356 = vector.broadcast %cst_115 : f32 to vector<16x128xf32>
    %357 = arith.subf %356, %347 : vector<16x128xf32>
    %358 = arith.mulf %357, %357 : vector<16x128xf32>
    %359 = arith.mulf %358, %358 : vector<16x128xf32>
    %360 = arith.mulf %206, %212 : vector<16x128xf32>
    %361 = arith.mulf %360, %351 : vector<16x128xf32>
    %362 = vector.shape_cast %361 : vector<16x128xf32> to vector<1x16x128xf32>
    %cst_116 = arith.constant dense<0.000000e+00> : vector<1xf32>
    %363 = vector.multi_reduction <add>, %362, %cst_116 [1, 2] : vector<1x16x128xf32> to vector<1xf32>
    %364 = vector.shape_cast %363 : vector<1xf32> to vector<1x1x1xf32>
    %365 = vector.extract %364[0, 0, 0] : f32 from vector<1x1x1xf32>
    %366 = arith.mulf %209, %213 : vector<16x128xf32>
    %367 = arith.mulf %366, %359 : vector<16x128xf32>
    %368 = arith.mulf %367, %355 : vector<16x128xf32>
    %369 = vector.shape_cast %368 : vector<16x128xf32> to vector<1x16x128xf32>
    %cst_117 = arith.constant dense<0.000000e+00> : vector<1xf32>
    %370 = vector.multi_reduction <add>, %369, %cst_117 [1, 2] : vector<1x16x128xf32> to vector<1xf32>
    %371 = vector.shape_cast %370 : vector<1xf32> to vector<1x1x1xf32>
    %372 = vector.extract %371[0, 0, 0] : f32 from vector<1x1x1xf32>
    %373 = vector.shape_cast %351 : vector<16x128xf32> to vector<1x16x128xf32>
    %cst_118 = arith.constant dense<0.000000e+00> : vector<1xf32>
    %374 = vector.multi_reduction <add>, %373, %cst_118 [1, 2] : vector<1x16x128xf32> to vector<1xf32>
    %375 = vector.shape_cast %374 : vector<1xf32> to vector<1x1x1xf32>
    %376 = vector.extract %375[0, 0, 0] : f32 from vector<1x1x1xf32>
    %cst_119 = arith.constant 0.000000e+00 : f32
    %377 = arith.cmpf oeq, %376, %cst_119 : f32
    %378 = arith.extui %377 : i1 to i32
    %379 = arith.sitofp %378 : i32 to f32
    %cst_120 = arith.constant 0.000000e+00 : f32
    %380 = arith.subf %cst_120, %372 : f32
    %381 = arith.mulf %380, %379 : f32
    %382 = arith.addf %365, %372 : f32
    %383 = arith.addf %376, %379 : f32
    %384 = arith.divf %382, %383 : f32
    %cst_121 = arith.constant 1.000000e+00 : f32
    %385 = arith.subf %cst_121, %379 : f32
    %386 = arith.mulf %384, %385 : f32
    %387 = arith.subf %381, %386 : f32
    %388 = arith.index_cast %arg0 : i32 to index
    %c3_122 = arith.constant 3 : index
    %389 = memref.load %arg6[%388, %c3_122] : memref<2x4xf32, #tpu.memory_space<smem>>
    memref.store %387, %arg6[%388, %c3_122] : memref<2x4xf32, #tpu.memory_space<smem>>
    return
  }
  func.func @transform_0(%arg0: i32) -> (i32, i32, i32) {
    %c0_i32 = arith.constant 0 : i32
    %c0_i32_0 = arith.constant 0 : i32
    %c0_i32_1 = arith.constant 0 : i32
    return %arg0, %c0_i32, %c0_i32_0 : i32, i32, i32
  }
  func.func @transform_1(%arg0: i32) -> (i32, i32, i32) {
    %c0_i32 = arith.constant 0 : i32
    %c0_i32_0 = arith.constant 0 : i32
    %c0_i32_1 = arith.constant 0 : i32
    return %arg0, %c0_i32, %c0_i32_0 : i32, i32, i32
  }
  func.func @transform_2(%arg0: i32) -> (i32, i32, i32, i32) {
    %c0_i32 = arith.constant 0 : i32
    %c0_i32_0 = arith.constant 0 : i32
    %c0_i32_1 = arith.constant 0 : i32
    %c0_i32_2 = arith.constant 0 : i32
    return %arg0, %c0_i32, %c0_i32_0, %c0_i32_1 : i32, i32, i32, i32
  }
  func.func @transform_3(%arg0: i32) -> (i32, i32, i32, i32) {
    %c0_i32 = arith.constant 0 : i32
    %c0_i32_0 = arith.constant 0 : i32
    %c0_i32_1 = arith.constant 0 : i32
    %c0_i32_2 = arith.constant 0 : i32
    return %arg0, %c0_i32, %c0_i32_0, %c0_i32_1 : i32, i32, i32, i32
  }
  func.func @transform_4(%arg0: i32) -> (i32, i32) {
    %c0_i32 = arith.constant 0 : i32
    %c0_i32_0 = arith.constant 0 : i32
    %c0_i32_1 = arith.constant 0 : i32
    return %c0_i32, %c0_i32_0 : i32, i32
  }
  func.func @transform_5(%arg0: i32) -> (i32, i32) {
    %c0_i32 = arith.constant 0 : i32
    %c0_i32_0 = arith.constant 0 : i32
    %c0_i32_1 = arith.constant 0 : i32
    return %c0_i32, %c0_i32_0 : i32, i32
  }
}

</mosaic_0001>

<bundles_post_ra>
// kernel: tpu_custom_call.1
= control target key start
LH: loop header
LB: loop body
LE: loop exit
PB: predicated region body
PF: predicated region fallthrough
CT: control target
= control target key end

     0   :  { %s2067_s0 = inlined_call_operand.hbm [shape: f32[2,2,128], index: 0, kind: input, shape index: {}]   ;;  %s2068_s1 = inlined_call_operand.hbm [shape: f32[2,16,128], index: 1, kind: input, shape index: {}]   ;;  %s2069_s2 = inlined_call_operand.hbm [shape: f32[2,4,2,128], index: 2, kind: input, shape index: {}]   ;;  %s2070_s3 = inlined_call_operand.hbm [shape: f32[2,4,16,128], index: 3, kind: input, shape index: {}]   ;;  %s2071_s4 = inlined_call_operand.hbm [shape: f32[2,4], index: 4, kind: output, shape index: {0}]   ;;  %s2072_s5 = inlined_call_operand.hbm [shape: f32[2,4], index: 5, kind: output, shape index: {1}]  }
   0x1   :  { %2078 = sst [smem:[#allocation18_spill]] %s2067_s0 }
   0x2   :  { %11 = vsyncpa [#allocation3], 0 }
   0x3   :  { %13 = vsyncpa [#allocation3 + $0x1], 0 }
   0x4   :  { %14 = vsyncpa [#allocation6], 0 }
   0x5   :  { %16 = vsyncpa [#allocation6 + $0x1], 0 }
   0x6   :  { %17 = vsyncpa [#allocation9], 0 }
   0x7   :  { %19 = vsyncpa [#allocation9 + $0x1], 0 }
   0x8   :  { %20 = vsyncpa [#allocation4], 0 }
   0x9   :  { %21 = vsyncpa [#allocation12], 0  ;;  %s1582_s18 = smov 0   ;;  %s1584_s19 = smov 0  }
   0xa   :  { %s1586_s20 = smov 0   ;;  %s1588_s21 = smov 0  }
   0xb LB: > { %s1601_s22 = sadd.s32 4294967295, %s1539_s21   ;;  %s1604_s23 = sadd.s32 1, %s1539_s21   ;;  %s1539_s21 = sphi %s1588_s21, %s2092_s21   ;;  %s1535_s20 = sphi %s1586_s20, %s2091_s20   ;;  %s1531_s19 = sphi %s1584_s19, %s2090_s19   ;;  %s1527_s18 = sphi %s1582_s18, %s2089_s18  }
   0xc   : > { %s31_s24 = ssub.s32 %s1539_s21, %s1604_s23  ;;  %s34_s25 = sadd.s32 1, %s1535_s20 }
   0xd   : > { %p32_p0 = scmp.eq.s32.totalorder %s31_s24, 0  ;;  %p41_p1 = scmp.ne.s32.totalorder %s1535_s20, %s1531_s19 }
   0xe   : > { %p42_p2 = scmp.eq.s32.totalorder %s1539_s21, 0  ;;  %p47_p3 = scmp.ne.s32.totalorder %s1531_s19, %s1527_s18 }
   0xf   : > { %s1614_s26 = scalar_select %p32_p0, %s1535_s20, %s34_s25  }
  0x10   : > { %p43_p4 = por %p42_p2, %p41_p1  ;;  %p48_p5 = scmp.eq.s32.totalorder %s1601_s22, 0 }
  0x11   : > { %p1261_p6 = scmp.lt.s32.totalorder %s1539_s21, 2  ;;  %s1623_s28 = sand.u32 1, %s1535_s20  }
  0x12   : > { %p1618_p7 = por %p48_p5, %p47_p3  ;;  %s209_s30 = sand.u32 1, %s1539_s21  }
  0x13   : > { %p1625_p8 = pnand %p1261_p6, %p43_p4  ;;  %s1102_s6 = sshll.u32 %s1623_s28, 4 }
  0x14   : > { %s2079_s27 = scalar_select %p1618_p7, 1, 0 }
  0x15   : > { %s2080_s29 = scalar_select %p1625_p8, 1, 0 }
  0x16   : > { %s1165_s7 = sshll.u32 %s1539_s21, 8  ;;  %s213_s8 = scalar_lea.vmem [#allocation5], %s1102_s6 }
  0x17   : > { %s220_s9 = sshll.u32 %s213_s8, 4  ;;  %s1635_s12 = scalar_lea.hbm %s2068_s1, %s1165_s7  ;;  %s1637_s9 = int_to_ptr.vmem [resolvable:$true] %s220_s9 }
  0x18   : > { %s1639_s13 = scalar_lea.sflag [#allocation6], %s209_s30  ;;  %s1345_s14 = scalar_lea.hbm %s1635_s12, 256 }
  0x19   : > { %p1346_p9 = scmp.ne.s32.totalorder %s1635_s12, %s1345_s14  ;;  %p1645_p10 = pneg %p1625_p8 }
  0x1a   : > { %s1350_s18 = scalar_lea.hbm %s2068_s1, 512  ;;  %p1351_p13 = scmp.lt.u32.totalorder %s1635_s12, %s2068_s1 }
  0x1b   : > { %p1348_p11 = pnand %p1645_p10, %p1346_p9  ;;  %p1352_p0 = scmp.lt.u32.totalorder %s1350_s18, %s1345_s14 }
  0x1c   : > { %p1354_p2 = scmp.lt.u32.totalorder %s1345_s14, %s1635_s12 }
  0x1d   : > { %p1349_p12 = pneg %p1348_p11  ;;  %p1353_p1 = por %p1352_p0, %p1351_p13 }
  0x1f   : > { %p1355_p3 = por %p1354_p2, %p1353_p1 }
  0x21   : > { %p1356_p4 = pnand %p1355_p3, %p1349_p12 }
  0x23   : > { %1359 = shalt.err (!%p1356_p4)
}
  0x24   : > { %s1360_s30 = scalar_lea.vmem %s1637_s9, 256  ;;  %s1541_s6 = smov [#allocation5]  }
  0x25   : > { %p1361_p5 = scmp.ne.s32.totalorder %s1637_s9, %s1360_s30  ;;  %s1365_s7 = sshll.u32 %s1541_s6, 4  ;;  %s1366_s7 = int_to_ptr.vmem [resolvable:$false] %s1365_s7 }
  0x26   : > { %s1367_s8 = scalar_lea.vmem %s1366_s7, 512  ;;  %p1368_p11 = scmp.lt.s32.totalorder %s1637_s9, %s1366_s7 }
  0x27   : > { %p1363_p6 = pnand %p1361_p5, %p1645_p10  ;;  %p1369_p7 = scmp.lt.s32.totalorder %s1367_s8, %s1360_s30 }
  0x29   : > { %p1364_p9 = pneg %p1363_p6  ;;  %p1370_p13 = por %p1369_p7, %p1368_p11 }
  0x2b   : > { %p1371_p0 = pnand %p1370_p13, %p1364_p9 }
  0x2d   : > { %1374 = shalt.err (!%p1371_p0)
}
  0x2e   : > { %s2074_s10 = smov 128   ;;  %s2077_s11 = smov 8  }
  0x2f   : > { %1254 = dma.hbm_to_vmem [thread:$0]  (!%p1625_p8), %s1635_s12, 256, %s1637_s9, %s1639_s13, %s2074_s10, %s2074_s10, %s2077_s11  }
  0x30   : > { %p1111_p7 = scmp.ge.s32.totalorder %s1539_s21, 1  ;;  %p270_p12 = scmp.lt.s32.totalorder %s1539_s21, 3 }
  0x31   : > { %s1100_s14 = sshll.u32 %s1623_s28, 1  ;;  %s1101_s17 = sshll.u32 %s1539_s21, 5 }
  0x32   : > { %p1675_p1 = pnand %p1111_p7, %p270_p12  ;;  %s195_s18 = scalar_lea.vmem [#allocation2], %s1100_s14 }
  0x33   : > { %s202_s24 = sshll.u32 %s195_s18, 4  ;;  %s2083_s0 = sld [smem:[#allocation18_spill]]  ;;  %s203_s24 = int_to_ptr.vmem [resolvable:$true] %s202_s24 }
  0x34   : > { %s2082_s16 = scalar_select %p1675_p1, 1, 0 }
  0x35   : > { %s192_s9 = scalar_lea.sflag [#allocation3], %s1623_s28 }
  0x39   : > { %s1683_s6 = scalar_lea.hbm %s2083_s0, %s1101_s17  ;;  %s1380_s14 = scalar_lea.hbm %s2083_s0, 64 }
  0x3a   : > { %s1375_s12 = scalar_lea.hbm %s1683_s6, 32  ;;  %p1381_p5 = scmp.lt.u32.totalorder %s1683_s6, %s2083_s0 }
  0x3b   : > { %p1376_p2 = scmp.ne.s32.totalorder %s1683_s6, %s1375_s12  ;;  %p1382_p6 = scmp.lt.u32.totalorder %s1380_s14, %s1375_s12 }
  0x3c   : > { %p1384_p11 = scmp.lt.u32.totalorder %s1375_s12, %s1683_s6 }
  0x3d   : > { %p1378_p3 = pnand %p1376_p2, %p1645_p10  ;;  %p1383_p9 = por %p1382_p6, %p1381_p5 }
  0x3f   : > { %p1379_p4 = pneg %p1378_p3  ;;  %p1385_p13 = por %p1384_p11, %p1383_p9 }
  0x41   : > { %p1386_p0 = pnand %p1385_p13, %p1379_p4 }
  0x43   : > { %1389 = shalt.err (!%p1386_p0)
}
  0x44   : > { %s1390_s17 = scalar_lea.vmem %s203_s24, 32  ;;  %s1544_s25 = smov [#allocation2]  }
  0x45   : > { %p1391_p7 = scmp.ne.s32.totalorder %s203_s24, %s1390_s17  ;;  %s1395_s30 = sshll.u32 %s1544_s25, 4  ;;  %s1396_s30 = int_to_ptr.vmem [resolvable:$false] %s1395_s30 }
  0x46   : > { %s1397_s7 = scalar_lea.vmem %s1396_s30, 64  ;;  %p1398_p3 = scmp.lt.s32.totalorder %s203_s24, %s1396_s30 }
  0x47   : > { %p1393_p12 = pnand %p1391_p7, %p1645_p10  ;;  %p1399_p1 = scmp.lt.s32.totalorder %s1397_s7, %s1390_s17 }
  0x49   : > { %p1394_p2 = pneg %p1393_p12  ;;  %p1400_p8 = por %p1399_p1, %p1398_p3 }
  0x4b   : > { %p1401_p5 = pnand %p1400_p8, %p1394_p2 }
  0x4d   : > { %1404 = shalt.err (!%p1401_p5)
}
  0x4e   : > { %p2084_p6 = scmp.ne.s32.totalorder %s2080_s29, 0  ;;  %s1105_s10 = sshll.u32 %s1623_s28, 3 }
  0x4f   : > { %s1166_s12 = sshll.u32 %s1539_s21, 7  ;;  %s234_s17 = scalar_lea.vmem [#allocation7], %s1105_s10 }
  0x50   : > { %1251 = dma.hbm_to_vmem [thread:$0]  (!%p2084_p6), %s1683_s6, 32, %s203_s24, %s192_s9  }
  0x51   : > { %s1708_s18 = scalar_lea.hbm %s2069_s2, %s1166_s12  ;;  %s241_s25 = sshll.u32 %s234_s17, 4  ;;  %s1710_s25 = int_to_ptr.vmem [resolvable:$true] %s241_s25 }
  0x52   : > { %s1405_s30 = scalar_lea.hbm %s1708_s18, 128  ;;  %s1410_s9 = scalar_lea.hbm %s2069_s2, 256 }
  0x53   : > { %p1406_p8 = scmp.ne.s32.totalorder %s1708_s18, %s1405_s30  ;;  %p1411_p9 = scmp.lt.u32.totalorder %s1708_s18, %s2069_s2 }
  0x54   : > { %p1412_p11 = scmp.lt.u32.totalorder %s1410_s9, %s1405_s30  ;;  %p1414_p0 = scmp.lt.u32.totalorder %s1405_s30, %s1708_s18 }
  0x55   : > { %p1408_p1 = pnand %p1406_p8, %p1645_p10 }
  0x56   : > { %p1413_p13 = por %p1412_p11, %p1411_p9 }
  0x57   : > { %p1409_p4 = pneg %p1408_p1 }
  0x58   : > { %p1415_p7 = por %p1414_p0, %p1413_p13 }
  0x5a   : > { %p1416_p12 = pnand %p1415_p7, %p1409_p4 }
  0x5c   : > { %1419 = shalt.err (!%p1416_p12)
}
  0x5d   : > { %s1420_s10 = scalar_lea.vmem %s1710_s25, 128  ;;  %s1545_s8 = smov [#allocation7]  }
  0x5e   : > { %p1421_p2 = scmp.ne.s32.totalorder %s1710_s25, %s1420_s10  ;;  %s1425_s14 = sshll.u32 %s1545_s8, 4  ;;  %s1426_s14 = int_to_ptr.vmem [resolvable:$false] %s1425_s14 }
  0x5f   : > { %s1427_s17 = scalar_lea.vmem %s1426_s14, 256  ;;  %p1428_p8 = scmp.lt.s32.totalorder %s1710_s25, %s1426_s14 }
  0x60   : > { %p1423_p3 = pnand %p1421_p2, %p1645_p10  ;;  %p1429_p1 = scmp.lt.s32.totalorder %s1427_s17, %s1420_s10 }
  0x62   : > { %p1424_p5 = pneg %p1423_p3  ;;  %p1430_p9 = por %p1429_p1, %p1428_p8 }
  0x64   : > { %p1431_p11 = pnand %p1430_p9, %p1424_p5 }
  0x66   : > { %1434 = shalt.err (!%p1431_p11)
}
  0x67   : > { %s1546_s30 = smov 32   ;;  %s1547_s24 = smov 2  }
  0x68   : > { %1257 = dma.hbm_to_vmem [thread:$0]  (!%p2084_p6), %s1708_s18, 128, %s1710_s25, %s1639_s13, %s1546_s30, %s1546_s30, %s1547_s24  }
  0x69   : > { %s1108_s6 = sshll.u32 %s1623_s28, 6  ;;  %s1167_s9 = sshll.u32 %s1539_s21, 10 }
  0x6a   : > { %s1739_s10 = scalar_lea.hbm %s2070_s3, %s1167_s9  ;;  %s255_s8 = scalar_lea.vmem [#allocation8], %s1108_s6 }
  0x6b   : > { %s262_s14 = sshll.u32 %s255_s8, 4  ;;  %s252_s17 = scalar_lea.sflag [#allocation9], %s1623_s28  ;;  %s1741_s14 = int_to_ptr.vmem [resolvable:$true] %s262_s14 }
  0x6c   : > { %s1435_s11 = scalar_lea.hbm %s1739_s10, 1024  ;;  %s1440_s18 = scalar_lea.hbm %s2070_s3, 2048 }
  0x6d   : > { %p1436_p4 = scmp.ne.s32.totalorder %s1739_s10, %s1435_s11  ;;  %p1441_p7 = scmp.lt.u32.totalorder %s1739_s10, %s2070_s3 }
  0x6e   : > { %p1442_p12 = scmp.lt.u32.totalorder %s1440_s18, %s1435_s11  ;;  %p1444_p3 = scmp.lt.u32.totalorder %s1435_s11, %s1739_s10 }
  0x6f   : > { %p1438_p13 = pnand %p1436_p4, %p1645_p10 }
  0x70   : > { %p1443_p2 = por %p1442_p12, %p1441_p7 }
  0x71   : > { %p1439_p0 = pneg %p1438_p13 }
  0x72   : > { %p1445_p5 = por %p1444_p3, %p1443_p2 }
  0x74   : > { %p1446_p8 = pnand %p1445_p5, %p1439_p0 }
  0x76   : > { %1449 = shalt.err (!%p1446_p8)
}
  0x77   : > { %s1450_s24 = scalar_lea.vmem %s1741_s14, 1024  ;;  %s1548_s6 = smov [#allocation8]  }
  0x78   : > { %p1451_p1 = scmp.ne.s32.totalorder %s1741_s14, %s1450_s24  ;;  %s1455_s9 = sshll.u32 %s1548_s6, 4  ;;  %s1456_s9 = int_to_ptr.vmem [resolvable:$false] %s1455_s9 }
  0x79   : > { %s1457_s7 = scalar_lea.vmem %s1456_s9, 2048  ;;  %p1458_p4 = scmp.lt.s32.totalorder %s1741_s14, %s1456_s9 }
  0x7a   : > { %p1453_p9 = pnand %p1451_p1, %p1645_p10  ;;  %p1459_p13 = scmp.lt.s32.totalorder %s1457_s7, %s1450_s24 }
  0x7c   : > { %p1454_p11 = pneg %p1453_p9  ;;  %p1460_p7 = por %p1459_p13, %p1458_p4 }
  0x7e   : > { %p1461_p12 = pnand %p1460_p7, %p1454_p11 }
  0x80   : > { %1464 = shalt.err (!%p1461_p12)
}
  0x81   : > { %s2085_s11 = smov 8   ;;  %s2086_s12 = smov 128  }
  0x82   : > { %1260 = dma.hbm_to_vmem [thread:$0]  (!%p2084_p6), %s1739_s10, 1024, %s1741_s14, %s252_s17, %s2086_s12, %s2086_s12, %s2085_s11  }
  0x83   : > { %p2087_p10 = scmp.ne.s32.totalorder %s2082_s16, 0 }
  0x84   : > { %s276_s15 = sand.u32 (!%p2087_p10), 1, %s1531_s19   ;;  %p2088_p0 = scmp.ne.s32.totalorder (!%p2087_p10), %s2079_s27, 0 }
  0x85   : > { %274 = sbr.rel (%p2087_p10) target bundleno = 1016 (0x3f8), region = 36  ;;  %s1112_s8 = sshll.u32 (!%p2087_p10), %s276_s15, 1 }
  0x86   : > { %s277_s21 = scalar_lea.sflag (!%p2087_p10), [#allocation3], %s276_s15  ;;  %s280_s13 = scalar_lea.vmem (!%p2087_p10), [#allocation2], %s1112_s8 }
  0x8c   : > { %1506 = dma.done.wait (%p2088_p0), %s277_s21, 32  }
  0x8d   : > { %1508 = vsyncadd (%p2088_p0), %s277_s21, 4294967264  ;;  %s285_s28 = sand.u32 1, %s1601_s22   ;;  %s1113_s29 = sshll.u32 %s276_s15, 4 }
  0x8e   : > { %s286_s18 = scalar_lea.sflag [#allocation6], %s285_s28  ;;  %s1778_s10 = scalar_lea.vmem [#allocation5], %s1113_s29 }
  0x8f   : > { %1510 = dma.done.wait (%p2088_p0), %s286_s18, 384  }
  0x90   : > { %1512 = vsyncadd (%p2088_p0), %s286_s18, 4294966912  ;;  %s1114_s16 = sshll.u32 %s276_s15, 3  ;;  %s1115_s14 = sshll.u32 %s276_s15, 6 }
  0x91   : > { %s1784_s17 = scalar_lea.vmem [#allocation7], %s1114_s16  ;;  %s304_s25 = scalar_lea.sflag [#allocation9], %s276_s15 }
  0x92   : > { %s1786_s30 = scalar_lea.vmem [#allocation8], %s1115_s14 }
  0x93   : > { %1514 = dma.done.wait (%p2088_p0), %s304_s25, 1024  }
  0x94   : > { %1516 = vsyncadd (%p2088_p0), %s304_s25, 4294966272  ;;  %v360_v0 = vld [vmem:[%s1784_s17] sm:$0x3]  ;;  %vm372_vm0 = vcmask 1041408   ;;  %v344_v1 = vld [vmem:[%s280_s13] sm:$0x3] }
  0x95   : > { %vm361_vm1 = vcmp.eq.f32.partialorder %v360_v0, 1.0  ;;  %v1116_v2 = vmul.f32 -1.442695, %v344_v1  ;;  %v1549_v3 = vmov 0.0   ;;  %v1120_v12 = vld [vmem:[%s1784_s17 + $0x2] sm:$0x3] }
  0x96   : > { %v1117_v4 = vsel %vm361_vm1, 1.0, %v1549_v3  ;;  %v1124_v13 = vld [vmem:[%s1784_s17 + $0x4] sm:$0x3]  ;;  %v367_v14 = vsub.f32 1.0, %v360_v0  ;;  %v431_v15 = vsub.f32 1.0, %v1120_v12  ;;  %vm425_vm2 = vcmp.eq.f32.partialorder %v1120_v12, 1.0 }
  0x97   : > { %v396_v5 = vsel %vm372_vm0, %v1117_v4, 0.0  ;;  %1305 = vpow2.f32 %v1116_v2  ;;  %v492_v16 = vsub.f32 1.0, %v1124_v13  ;;  %vm364_vm3 = vcmp.lt.f32.partialorder %v360_v0, 1.0  ;;  %v1128_v53 = vld [vmem:[%s1784_s17 + $0x6] sm:$0x3]  ;;  %v607_v2 = vld [vmem:[%s1778_s10 + $0x8] sm:$0xff] }
  0x98   : > { %397 = vadd.xlane.f32.xlu1 %v396_v5  ;;  %v368_v17 = vmul.f32 %v367_v14, %v367_v14  ;;  %v432_v19 = vmul.f32 %v431_v15, %v431_v15  ;;  %v1121_v26 = vsel %vm425_vm2, 1.0, %v1549_v3  ;;  %vm428_vm4 = vcmp.lt.f32.partialorder %v1120_v12, 1.0  ;;  %v606_v1 = vld [vmem:[%s1778_s10] sm:$0xff]  ;;  %s1119_s21 = sshll.u32 %s1601_s22, 7  ;;  %p1262_p11 = scmp.eq.s32.totalorder %s1601_s22, 1 }
  0x99   : > { %v493_v21 = vmul.f32 %v492_v16, %v492_v16  ;;  %vm489_vm5 = vcmp.lt.f32.partialorder %v1124_v13, 1.0  ;;  %v1118_v34 = vsel %vm364_vm3, 1.0, %v1549_v3  ;;  %v1122_v35 = vsel %vm428_vm4, 1.0, %v1549_v3 }
  0x9a   : > { %v369_v25 = vmul.f32 %v368_v17, %v368_v17  ;;  %v433_v29 = vmul.f32 %v432_v19, %v432_v19  ;;  %vm486_vm6 = vcmp.eq.f32.partialorder %v1124_v13, 1.0  ;;  %v1126_v36 = vsel %vm489_vm5, 1.0, %v1549_v3 }
  0x9b   : > { %v494_v30 = vmul.f32 %v493_v21, %v493_v21  ;;  %v457_v43 = vsel %vm372_vm0, %v1121_v26, 0.0  ;;  %v1125_v45 = vsel %vm486_vm6, 1.0, %v1549_v3  ;;  %v553_v54 = vsub.f32 1.0, %v1128_v53  ;;  %v638_v21 = vld [vmem:[%s1786_s30] sm:$0xff] }
  0x9c   : > { %v518_v52 = vsel %vm372_vm0, %v1125_v45, 0.0  ;;  %vm547_vm7 = vcmp.eq.f32.partialorder %v1128_v53, 1.0  ;;  %vm550_vm8 = vcmp.lt.f32.partialorder %v1128_v53, 1.0  ;;  %v1133_v5 = vmul.f32 -1.442695, %v607_v2 }
  0x9d   : > { %v554_v55 = vmul.f32 %v553_v54, %v553_v54  ;;  %v1129_v56 = vsel %vm547_vm7, 1.0, %v1549_v3  ;;  %v1130_v61 = vsel %vm550_vm8, 1.0, %v1549_v3  ;;  %vm640_vm9 = vcmp.eq.f32.partialorder %v638_v21, 1.0 }
  0x9e   : > { %v579_v63 = vsel %vm372_vm0, %v1129_v56, 0.0  ;;  %vm646_vm11 = vcmp.lt.f32.partialorder %v638_v21, 1.0 }
  0x9f   : > { %v555_v58 = vmul.f32 %v554_v55, %v554_v55 }
  0xa1   : > { %v1306_v6 = vpop.eup %1305 }
  0xa2   : > { %v348_v7 = vadd.f32 1.0, %v1306_v6 }
  0xa4   : > { %1307 = vrcp.f32 %v348_v7 }
  0xae   : > { %v1308_v8 = vpop.eup %1307 }
  0xaf   : > { %v351_v9 = vmax.f32 %v1308_v8, 0.0001 }
  0xb1   : > { %v352_v10 = vmin.f32 %v351_v9, 0.9999 }
  0xb3   : > { %1309 = vlog2.f32 %v352_v10  ;;  %v355_v11 = vsub.f32 1.0, %v352_v10  ;;  %v359_v23 = vmul.f32 %v352_v10, %v352_v10 }
  0xb5   : > { %1311 = vlog2.f32 %v355_v11  ;;  %v358_v18 = vmul.f32 %v355_v11, %v355_v11 }
  0xbd   : > { %v1310_v20 = vpop.eup %1309 }
  0xbe   : > { %v354_v22 = vmul.f32 0.6931472, %v1310_v20 }
  0xbf   : > { %v1312_v24 = vpop.eup %1311 }
  0xc0   : > { %v370_v27 = vmul.f32 %v358_v18, %v354_v22  ;;  %v357_v28 = vmul.f32 0.6931472, %v1312_v24  ;;  %v639_v22 = vld [vmem:[%s1786_s30 + $0x8] sm:$0xff] }
  0xc1   : > { %vm641_vm10 = vcmp.eq.f32.partialorder %v639_v22, 1.0  ;;  %vm647_vm12 = vcmp.lt.f32.partialorder %v639_v22, 1.0 }
  0xc2   : > { %v371_v31 = vmul.f32 %v1117_v4, %v370_v27  ;;  %v383_v32 = vmul.f32 %v359_v23, %v357_v28  ;;  %v434_v33 = vmul.f32 %v1121_v26, %v370_v27  ;;  %v495_v49 = vmul.f32 %v1125_v45, %v370_v27 }
  0xc3   : > { %v556_v57 = vmul.f32 %v1129_v56, %v370_v27  ;;  %v1132_v4 = vmul.f32 -1.442695, %v606_v1 }
  0xc4   : > { %v373_v37 = vsel %vm372_vm0, %v371_v31, 0.0  ;;  %v384_v38 = vmul.f32 %v383_v32, %v369_v25  ;;  %v435_v39 = vsel %vm372_vm0, %v434_v33, 0.0  ;;  %v445_v40 = vmul.f32 %v433_v29, %v383_v32 }
  0xc5   : > { %374 = vadd.xlane.f32.xlu0 %v373_v37  ;;  %436 = vadd.xlane.f32.xlu1 %v435_v39  ;;  %v506_v41 = vmul.f32 %v494_v30, %v383_v32  ;;  %v496_v51 = vsel %vm372_vm0, %v495_v49, 0.0  ;;  %v557_v59 = vsel %vm372_vm0, %v556_v57, 0.0  ;;  %v567_v60 = vmul.f32 %v555_v58, %v383_v32 }
  0xc6   : > { %v385_v42 = vmul.f32 %v1118_v34, %v384_v38  ;;  %v446_v44 = vmul.f32 %v1122_v35, %v445_v40  ;;  %1313 = vpow2.f32 %v1132_v4  ;;  %v1134_v32 = vsel %vm640_vm9, 1.0, %v1549_v3 }
  0xc7   : > { %v507_v46 = vmul.f32 %v1126_v36, %v506_v41  ;;  %v568_v62 = vmul.f32 %v1130_v61, %v567_v60  ;;  %1315 = vpow2.f32 %v1133_v5  ;;  %v1135_v33 = vsel %vm641_vm10, 1.0, %v1549_v3 }
  0xc8   : > { %v386_v47 = vsel %vm372_vm0, %v385_v42, 0.0  ;;  %v447_v48 = vsel %vm372_vm0, %v446_v44, 0.0  ;;  %v652_v38 = vsub.f32 1.0, %v638_v21  ;;  %v653_v44 = vsub.f32 1.0, %v639_v22 }
  0xc9   : > { %387 = vadd.xlane.f32.xlu0 %v386_v47  ;;  %458 = vadd.xlane.f32.xlu1 %v457_v43  ;;  %v508_v50 = vsel %vm372_vm0, %v507_v46, 0.0  ;;  %v569_v0 = vsel %vm372_vm0, %v568_v62, 0.0  ;;  %v688_v2 = vadd.f32 %v1135_v33, %v1134_v32  ;;  %v1136_v5 = vsel %vm646_vm11, 1.0, %v1549_v3 }
  0xca   : > { %v655_v57 = vmul.f32 %v653_v44, %v653_v44 }
  0xcd   : > { %448 = vadd.xlane.f32.xlu0 %v447_v48  ;;  %509 = vadd.xlane.f32.xlu1 %v508_v50  ;;  %v654_v50 = vmul.f32 %v652_v38, %v652_v38 }
  0xcf   : > { %v656_v61 = vmul.f32 %v654_v50, %v654_v50 }
  0xd0   : > { %v1314_v6 = vpop.eup %1313 }
  0xd1   : > { %497 = vadd.xlane.f32.xlu0 %v496_v51  ;;  %558 = vadd.xlane.f32.xlu1 %v557_v59  ;;  %v1316_v7 = vpop.eup %1315  ;;  %v614_v8 = vadd.f32 1.0, %v1314_v6  ;;  %v1137_v6 = vsel %vm647_vm12, 1.0, %v1549_v3 }
  0xd2   : > { %v615_v9 = vadd.f32 1.0, %v1316_v7 }
  0xd3   : > { %1317 = vrcp.f32 %v614_v8 }
  0xd4   : > { %1319 = vrcp.f32 %v615_v9 }
  0xd5   : > { %519 = vadd.xlane.f32.xlu0 %v518_v52  ;;  %580 = vadd.xlane.f32.xlu1 %v579_v63  ;;  %v657_v63 = vmul.f32 %v655_v57, %v655_v57 }
  0xd9   : > { %570 = vadd.xlane.f32.xlu0 %v569_v0 }
  0xdd   : > { %v1318_v10 = vpop.eup %1317 }
  0xde   : > { %v1320_v11 = vpop.eup %1319  ;;  %v620_v12 = vmax.f32 %v1318_v10, 0.0001 }
  0xdf   : > { %v621_v13 = vmax.f32 %v1320_v11, 0.0001 }
  0xe0   : > { %v622_v14 = vmin.f32 %v620_v12, 0.9999 }
  0xe1   : > { %v623_v15 = vmin.f32 %v621_v13, 0.9999  ;;  %v1138_v13 = vld [vmem:[%s1786_s30 + $0x10] sm:$0xff] }
  0xe2   : > { %1321 = vlog2.f32 %v622_v14  ;;  %v628_v16 = vsub.f32 1.0, %v622_v14  ;;  %v636_v55 = vmul.f32 %v622_v14, %v622_v14  ;;  %v1139_v14 = vld [vmem:[%s1786_s30 + $0x18] sm:$0xff]  ;;  %vm717_vm13 = vcmp.eq.f32.partialorder %v1138_v13, 1.0 }
  0xe3   : > { %1323 = vlog2.f32 %v623_v15  ;;  %v629_v18 = vsub.f32 1.0, %v623_v15  ;;  %v637_v56 = vmul.f32 %v623_v15, %v623_v15  ;;  %vm718_vm14 = vcmp.eq.f32.partialorder %v1139_v14, 1.0 }
  0xe4   : > { %1325 = vlog2.f32 %v628_v16  ;;  %v634_v20 = vmul.f32 %v628_v16, %v628_v16  ;;  %v1140_v15 = vsel %vm717_vm13, 1.0, %v1549_v3  ;;  %v1141_v16 = vsel %vm718_vm14, 1.0, %v1549_v3 }
  0xe5   : > { %1327 = vlog2.f32 %v629_v18  ;;  %v635_v26 = vmul.f32 %v629_v18, %v629_v18  ;;  %vm723_vm15 = vcmp.lt.f32.partialorder %v1138_v13, 1.0  ;;  %vm724_vm0 = vcmp.lt.f32.partialorder %v1139_v14, 1.0 }
  0xe6   : > { %v1143_v50 = vsel %vm724_vm0, 1.0, %v1549_v3 }
  0xec   : > { %v1322_v23 = vpop.eup %1321 }
  0xed   : > { %v1324_v27 = vpop.eup %1323  ;;  %v625_v29 = vmul.f32 0.6931472, %v1322_v23 }
  0xee   : > { %v627_v30 = vmul.f32 0.6931472, %v1324_v27  ;;  %v1326_v41 = vpop.eup %1325 }
  0xef   : > { %v1822_v34 = vmul.f32 %v634_v20, %v625_v29  ;;  %v1328_v45 = vpop.eup %1327  ;;  %v631_v53 = vmul.f32 0.6931472, %v1326_v41 }
  0xf0   : > { %v1824_v37 = vmul.f32 %v635_v26, %v627_v30  ;;  %v633_v54 = vmul.f32 0.6931472, %v1328_v45 }
  0xf1   : > { %v660_v42 = vmul.f32 %v1134_v32, %v1822_v34  ;;  %v1828_v0 = vmul.f32 %v636_v55, %v631_v53 }
  0xf2   : > { %v661_v43 = vmul.f32 %v1135_v33, %v1824_v37  ;;  %v1830_v1 = vmul.f32 %v637_v56, %v633_v54  ;;  %v736_v18 = vmul.f32 %v1141_v16, %v1824_v37  ;;  %v729_v33 = vsub.f32 1.0, %v1138_v13 }
  0xf3   : > { %v674_v8 = vmul.f32 %v1828_v0, %v656_v61  ;;  %v761_v56 = vadd.f32 %v1141_v16, %v1140_v15 }
  0xf4   : > { %v662_v49 = vadd.f32 %v661_v43, %v660_v42  ;;  %v675_v9 = vmul.f32 %v1830_v1, %v657_v63 }
  0xf5   : > { %v676_v10 = vmul.f32 %v1136_v5, %v674_v8 }
  0xf6   : > { %663 = vadd.xlane.f32.xlu0 %v662_v49  ;;  %v677_v11 = vmul.f32 %v1137_v6, %v675_v9  ;;  %v1142_v49 = vsel %vm723_vm15, 1.0, %v1549_v3 }
  0xf8   : > { %v678_v12 = vadd.f32 %v677_v11, %v676_v10 }
  0xfa   : > { %689 = vadd.xlane.f32.xlu0 %v688_v2  ;;  %679 = vadd.xlane.f32.xlu1 %v678_v12 }
 0x125   : > { %v398_v17 = vpop.xlane.xlu1 %397 }
 0x126   : > { %v399_v19 = vrot.slane %v398_v17, 4 }
 0x128   : > { %v400_v24 = vadd.f32 %v399_v19, %v398_v17  ;;  %v735_v17 = vmul.f32 %v1140_v15, %v1822_v34 }
 0x12a   : > { %v401_v35 = vrot.slane %v400_v24, 2  ;;  %v737_v19 = vadd.f32 %v736_v18, %v735_v17 }
 0x12c   : > { %v402_v48 = vadd.f32 %v401_v35, %v400_v24  ;;  %738 = vadd.xlane.f32.xlu1 %v737_v19  ;;  %v730_v35 = vsub.f32 1.0, %v1139_v14 }
 0x12e   : > { %v403_v60 = vrot.slane %v402_v48, 1 }
 0x130   : > { %v404_v7 = vadd.f32 %v403_v60, %v402_v48  ;;  %762 = vadd.xlane.f32.xlu1 %v761_v56  ;;  %v1146_v60 = vld [vmem:[%s1786_s30 + $0x28] sm:$0xff] }
 0x131   : > { %vm791_vm2 = vcmp.eq.f32.partialorder %v1146_v60, 1.0  ;;  %v803_v19 = vsub.f32 1.0, %v1146_v60  ;;  %vm797_vm4 = vcmp.lt.f32.partialorder %v1146_v60, 1.0 }
 0x152   : > { %v375_v25 = vpop.xlane.xlu0 %374  ;;  %v437_v20 = vpop.xlane.xlu1 %436 }
 0x153   : > { %v376_v28 = vrot.slane %v375_v25, 4  ;;  %v438_v23 = vrot.slane %v437_v20, 4 }
 0x155   : > { %v377_v31 = vadd.f32 %v376_v28, %v375_v25  ;;  %v439_v26 = vadd.f32 %v438_v23, %v437_v20  ;;  %v805_v23 = vmul.f32 %v803_v19, %v803_v19 }
 0x156   : > { %v388_v36 = vpop.xlane.xlu0 %387  ;;  %v459_v22 = vpop.xlane.xlu1 %458 }
 0x157   : > { %v378_v39 = vrot.slane %v377_v31, 2  ;;  %v389_v40 = vrot.slane %v388_v36, 4  ;;  %v460_v25 = vrot.slane %v459_v22, 4  ;;  %v440_v29 = vrot.slane %v439_v26, 2 }
 0x159   : > { %v390_v46 = vadd.f32 %v389_v40, %v388_v36  ;;  %v379_v47 = vadd.f32 %v378_v39, %v377_v31  ;;  %v461_v28 = vadd.f32 %v460_v25, %v459_v22  ;;  %v441_v36 = vadd.f32 %v440_v29, %v439_v26 }
 0x15a   : > { %v449_v21 = vpop.xlane.xlu0 %448  ;;  %v731_v39 = vmul.f32 %v729_v33, %v729_v33  ;;  %v732_v40 = vmul.f32 %v730_v35, %v730_v35  ;;  %v510_v6 = vpop.xlane.xlu1 %509  ;;  %v807_v26 = vmul.f32 %v805_v23, %v805_v23  ;;  %v1150_v33 = vsel %vm797_vm4, 1.0, %v1549_v3 }
 0x15b   : > { %v391_v51 = vrot.slane %v390_v46, 2  ;;  %v380_v52 = vrot.slane %v379_v47, 1  ;;  %v450_v24 = vrot.slane %v449_v21, 4  ;;  %v462_v32 = vrot.slane %v461_v28, 2 }
 0x15c   : > { %v733_v42 = vmul.f32 %v731_v39, %v731_v39  ;;  %v734_v43 = vmul.f32 %v732_v40, %v732_v40  ;;  %v442_v44 = vrot.slane %v441_v36, 1  ;;  %v511_v9 = vrot.slane %v510_v6, 4 }
 0x15d   : > { %v381_v58 = vadd.f32 %v380_v52, %v379_v47  ;;  %v392_v59 = vadd.f32 %v391_v51, %v390_v46  ;;  %v451_v27 = vadd.f32 %v450_v24, %v449_v21  ;;  %v463_v41 = vadd.f32 %v462_v32, %v461_v28 }
 0x15e   : > { %v747_v46 = vmul.f32 %v733_v42, %v1828_v0  ;;  %v748_v47 = vmul.f32 %v734_v43, %v1830_v1  ;;  %v443_v54 = vadd.f32 %v442_v44, %v441_v36  ;;  %v498_v5 = vpop.xlane.xlu0 %497  ;;  %v512_v12 = vadd.f32 %v511_v9, %v510_v6  ;;  %v1152_v44 = vld [vmem:[%s1786_s30 + $0x30] sm:$0xff] }
 0x15f   : > { %1168 = vpush %v381_v58  ;;  %v393_v62 = vrot.slane %v392_v59, 1  ;;  %v452_v30 = vrot.slane %v451_v27, 2  ;;  %v464_v48 = vrot.slane %v463_v41, 1  ;;  %v499_v8 = vrot.slane %v498_v5, 4 }
 0x160   : > { %v749_v51 = vmul.f32 %v1142_v49, %v747_v46  ;;  %v750_v52 = vmul.f32 %v1143_v50, %v748_v47  ;;  %v513_v15 = vrot.slane %v512_v12, 2  ;;  %vm863_vm5 = vcmp.eq.f32.partialorder %v1152_v44, 1.0 }
 0x161   : > { %v394_v4 = vadd.f32 %v393_v62, %v392_v59  ;;  %v453_v38 = vadd.f32 %v452_v30, %v451_v27  ;;  %v465_v58 = vadd.f32 %v464_v48, %v463_v41  ;;  %v1145_v59 = vld [vmem:[%s1786_s30 + $0x20] sm:$0xff]  ;;  %v1148_v62 = vsel %vm791_vm2, 1.0, %v1549_v3 }
 0x162   : > { %v751_v57 = vadd.f32 %v750_v52, %v749_v51  ;;  %vm790_vm1 = vcmp.eq.f32.partialorder %v1145_v59, 1.0  ;;  %v809_v2 = vmul.f32 %v1148_v62, %v1824_v37  ;;  %v500_v11 = vadd.f32 %v499_v8, %v498_v5  ;;  %v559_v51 = vpop.xlane.xlu1 %558 }
 0x163   : > { %1170 = vpush %v394_v4  ;;  %v454_v45 = vrot.slane %v453_v38, 1  ;;  %v1862_v61 = vsel %vm790_vm1, 1.0, %v1549_v3  ;;  %v802_v18 = vsub.f32 1.0, %v1145_v59  ;;  %v514_v21 = vadd.f32 %v513_v15, %v512_v12 }
 0x164   : > { %1172 = vpush %v404_v7  ;;  %752 = vadd.xlane.f32.xlu0 %v751_v57  ;;  %v808_v63 = vmul.f32 %v1862_v61, %v1822_v34  ;;  %v520_v7 = vpop.xlane.xlu0 %519  ;;  %v501_v14 = vrot.slane %v500_v11, 2  ;;  %vm796_vm3 = vcmp.lt.f32.partialorder %v1145_v59, 1.0  ;;  %v821_v30 = vmul.f32 %v807_v26, %v1830_v1 }
 0x165   : > { %v455_v55 = vadd.f32 %v454_v45, %v453_v38  ;;  %v521_v10 = vrot.slane %v520_v7, 4  ;;  %v804_v22 = vmul.f32 %v802_v18, %v802_v18  ;;  %v515_v28 = vrot.slane %v514_v21, 1  ;;  %v1153_v45 = vld [vmem:[%s1786_s30 + $0x38] sm:$0xff] }
 0x166   : > { %v810_v4 = vadd.f32 %v809_v2, %v808_v63  ;;  %v502_v20 = vadd.f32 %v501_v14, %v500_v11  ;;  %v1149_v32 = vsel %vm796_vm3, 1.0, %v1549_v3  ;;  %v823_v36 = vmul.f32 %v1150_v33, %v821_v30 }
 0x167   : > { %v522_v13 = vadd.f32 %v521_v10, %v520_v7  ;;  %v806_v25 = vmul.f32 %v804_v22, %v804_v22  ;;  %v516_v40 = vadd.f32 %v515_v28, %v514_v21  ;;  %v834_v42 = vadd.f32 %v1148_v62, %v1862_v61 }
 0x168   : > { %811 = vadd.xlane.f32.xlu0 %v810_v4  ;;  %v503_v27 = vrot.slane %v502_v20, 1  ;;  %vm864_vm6 = vcmp.eq.f32.partialorder %v1153_v45, 1.0  ;;  %v1154_v46 = vsel %vm863_vm5, 1.0, %v1549_v3  ;;  %v571_v52 = vpop.xlane.xlu0 %570  ;;  %v875_v62 = vsub.f32 1.0, %v1152_v44 }
 0x169   : > { %v523_v17 = vrot.slane %v522_v13, 2  ;;  %v820_v29 = vmul.f32 %v806_v25, %v1828_v0  ;;  %v1155_v47 = vsel %vm864_vm6, 1.0, %v1549_v3  ;;  %v881_v48 = vmul.f32 %v1154_v46, %v1822_v34  ;;  %v581_v34 = vpop.xlane.xlu1 %580 }
 0x16a   : > { %v504_v39 = vadd.f32 %v503_v27, %v502_v20  ;;  %v882_v49 = vmul.f32 %v1155_v47, %v1824_v37  ;;  %v560_v37 = vrot.slane %v559_v51, 4  ;;  %v876_v63 = vsub.f32 1.0, %v1153_v45 }
 0x16b   : > { %v524_v24 = vadd.f32 %v523_v17, %v522_v13  ;;  %v822_v35 = vmul.f32 %v1149_v32, %v820_v29  ;;  %v877_v5 = vmul.f32 %v875_v62, %v875_v62  ;;  %vm869_vm7 = vcmp.lt.f32.partialorder %v1152_v44, 1.0 }
 0x16c   : > { %835 = vadd.xlane.f32.xlu0 %v834_v42  ;;  %v883_v50 = vadd.f32 %v882_v49, %v881_v48  ;;  %v878_v6 = vmul.f32 %v876_v63, %v876_v63  ;;  %vm870_vm8 = vcmp.lt.f32.partialorder %v1153_v45, 1.0  ;;  %v1156_v15 = vsel %vm869_vm7, 1.0, %v1549_v3 }
 0x16d   : > { %v824_v41 = vadd.f32 %v823_v36, %v822_v35  ;;  %v879_v8 = vmul.f32 %v877_v5, %v877_v5  ;;  %v907_v22 = vadd.f32 %v1155_v47, %v1154_v46 }
 0x16e   : > { %v880_v9 = vmul.f32 %v878_v6, %v878_v6 }
 0x16f   : > { %825 = vadd.xlane.f32.xlu1 %v824_v41  ;;  %v893_v12 = vmul.f32 %v879_v8, %v1828_v0 }
 0x170   : > { %v894_v13 = vmul.f32 %v880_v9, %v1830_v1 }
 0x171   : > { %v895_v17 = vmul.f32 %v1156_v15, %v893_v12 }
 0x173   : > { %884 = vadd.xlane.f32.xlu1 %v883_v50 }
 0x177   : > { %908 = vadd.xlane.f32.xlu1 %v907_v22 }
 0x187   : > { %v680_v1 = vpop.xlane.xlu1 %679 }
 0x188   : > { %v681_v26 = vrot.slane %v680_v1, 4 }
 0x18a   : > { %v682_v29 = vadd.f32 %v681_v26, %v680_v1 }
 0x18c   : > { %v683_v33 = vrot.slane %v682_v29, 2 }
 0x190   : > { %s1842_s27 = spop %1168 }
 0x194   : > { %s1844_s24 = spop %1170 }
 0x195   : > { %s1173_s6 = spop %1172  ;;  %s411_s9 = sadd.f32 %s1844_s24, %s1842_s27 }
 0x196   : > { %p406_p6 = scmp.eq.f32.partialorder %s1173_s6, 0.0  ;;  %s409_s11 = ssub.f32 0.0, %s1844_s24 }
 0x198   : > { %s407_s7 = scalar_select %p406_p6, 1, 0 }
 0x19a   : > { %s1849_s12 = scvt.s32.f32 %s407_s7 }
 0x19c   : > { %s412_s15 = sadd.f32 %s1173_s6, %s1849_s12  ;;  %s1853_s8 = smul.f32 %s409_s11, %s1849_s12 }
 0x19d   : > { %s417_s28 = ssub.f32 1.0, %s1849_s12  ;;  %s1882_s6 = scalar_lea.smem [#allocation10], %s1119_s21 }
 0x19e   : > { %v413_v31 = vstv %s412_s15 }
 0x19f   : > { %1329 = vrcp.f32 %v413_v31  ;;  %v525_v31 = vrot.slane %v524_v24, 1 }
 0x1a1   : > { %v526_v43 = vadd.f32 %v525_v31, %v524_v24 }
 0x1a9   : > { %v1330_v53 = vpop.eup %1329 }
 0x1aa   : > { %1174 = vpush %v1330_v53  ;;  %v572_v53 = vrot.slane %v571_v52, 4 }
 0x1ab   : > { %1176 = vpush %v443_v54  ;;  %v582_v54 = vrot.slane %v581_v34, 4 }
 0x1ac   : > { %1178 = vpush %v455_v55  ;;  %v561_v55 = vadd.f32 %v560_v37, %v559_v51  ;;  %v573_v56 = vadd.f32 %v572_v53, %v571_v52 }
 0x1ad   : > { %1180 = vpush %v465_v58  ;;  %v583_v57 = vadd.f32 %v582_v54, %v581_v34 }
 0x1ae   : > { %v562_v58 = vrot.slane %v561_v55, 2  ;;  %v574_v59 = vrot.slane %v573_v56, 2 }
 0x1af   : > { %v584_v61 = vrot.slane %v583_v57, 2 }
 0x1b0   : > { %v563_v2 = vadd.f32 %v562_v58, %v561_v55  ;;  %v575_v4 = vadd.f32 %v574_v59, %v573_v56 }
 0x1b1   : > { %v585_v7 = vadd.f32 %v584_v61, %v583_v57 }
 0x1b2   : > { %v564_v10 = vrot.slane %v563_v2, 1  ;;  %v576_v11 = vrot.slane %v575_v4, 1 }
 0x1b3   : > { %v586_v14 = vrot.slane %v585_v7, 1 }
 0x1b4   : > { %v565_v20 = vadd.f32 %v564_v10, %v563_v2  ;;  %v577_v21 = vadd.f32 %v576_v11, %v575_v4 }
 0x1b5   : > { %v587_v0 = vadd.f32 %v586_v14, %v585_v7 }
 0x1b9   : > { %v739_v47 = vpop.xlane.xlu1 %738 }
 0x1ba   : > { %v740_v50 = vrot.slane %v739_v47, 4 }
 0x1bc   : > { %v741_v34 = vadd.f32 %v740_v50, %v739_v47 }
 0x1bd   : > { %v763_v49 = vpop.xlane.xlu1 %762 }
 0x1be   : > { %v764_v52 = vrot.slane %v763_v49, 4  ;;  %v742_v54 = vrot.slane %v741_v34, 2 }
 0x1c0   : > { %v765_v53 = vadd.f32 %v764_v52, %v763_v49  ;;  %v743_v58 = vadd.f32 %v742_v54, %v741_v34 }
 0x1c2   : > { %v766_v57 = vrot.slane %v765_v53, 2  ;;  %v744_v61 = vrot.slane %v743_v58, 1 }
 0x1c4   : > { %v745_v4 = vadd.f32 %v744_v61, %v743_v58 }
 0x1db   : > { %s1175_s13 = spop %1174 }
 0x1dc   : > { %s416_s29 = smul.f32 %s1175_s13, %s411_s9  ;;  %s1873_s18 = spop %1176 }
 0x1dd   : > { %s1875_s10 = spop %1178 }
 0x1de   : > { %s418_s16 = smul.f32 %s417_s28, %s416_s29  ;;  %s472_s14 = sadd.f32 %s1875_s10, %s1873_s18 }
 0x1df   : > { %s1181_s17 = spop %1180  ;;  %s470_s24 = ssub.f32 0.0, %s1875_s10 }
 0x1e0   : > { %s419_s25 = ssub.f32 %s1853_s8, %s418_s16  ;;  %p467_p2 = scmp.eq.f32.partialorder %s1181_s17, 0.0 }
 0x1e1   : > { %s1026_s29 = scalar_lea.smem %s1882_s6, 1 [#allocation10] }
 0x1e2   : > { %422 = sst [smem:[%s1882_s6]] %s419_s25 }
 0x1e3   : > { %s468_s27 = scalar_select %p467_p2, 1, 0 }
 0x1e5   : > { %s1886_s9 = scvt.s32.f32 %s468_s27 }
 0x1e7   : > { %s473_s7 = sadd.f32 %s1181_s17, %s1886_s9  ;;  %s1890_s11 = smul.f32 %s470_s24, %s1886_s9 }
 0x1e8   : > { %s478_s15 = ssub.f32 1.0, %s1886_s9 }
 0x1e9   : > { %v474_v16 = vstv %s473_s7 }
 0x1ea   : > { %1331 = vrcp.f32 %v474_v16  ;;  %v1157_v16 = vsel %vm870_vm8, 1.0, %v1549_v3  ;;  %v664_v3 = vpop.xlane.xlu0 %663 }
 0x1eb   : > { %v896_v18 = vmul.f32 %v1157_v16, %v894_v13  ;;  %v665_v25 = vrot.slane %v664_v3, 4 }
 0x1ed   : > { %v897_v23 = vadd.f32 %v896_v18, %v895_v17  ;;  %v666_v28 = vadd.f32 %v665_v25, %v664_v3 }
 0x1ee   : > { %v690_v24 = vpop.xlane.xlu0 %689 }
 0x1ef   : > { %898 = vadd.xlane.f32.xlu0 %v897_v23  ;;  %v691_v27 = vrot.slane %v690_v24, 4  ;;  %v667_v31 = vrot.slane %v666_v28, 2 }
 0x1f1   : > { %v692_v30 = vadd.f32 %v691_v27, %v690_v24  ;;  %v668_v36 = vadd.f32 %v667_v31, %v666_v28 }
 0x1f2   : > { %v753_v48 = vpop.xlane.xlu0 %752 }
 0x1f3   : > { %v693_v35 = vrot.slane %v692_v30, 2  ;;  %v754_v51 = vrot.slane %v753_v48, 4 }
 0x1f4   : > { %v1332_v38 = vpop.eup %1331 }
 0x1f5   : > { %1182 = vpush %v1332_v38  ;;  %v684_v38 = vadd.f32 %v683_v33, %v682_v29  ;;  %v755_v37 = vadd.f32 %v754_v51, %v753_v48 }
 0x1f6   : > { %1184 = vpush %v504_v39  ;;  %v694_v39 = vadd.f32 %v693_v35, %v692_v30  ;;  %v812_v7 = vpop.xlane.xlu0 %811 }
 0x1f7   : > { %1186 = vpush %v516_v40  ;;  %v669_v40 = vrot.slane %v668_v36, 1  ;;  %v685_v41 = vrot.slane %v684_v38, 1  ;;  %v756_v56 = vrot.slane %v755_v37, 2  ;;  %v813_v10 = vrot.slane %v812_v7, 4 }
 0x1f8   : > { %1188 = vpush %v526_v43  ;;  %v695_v42 = vrot.slane %v694_v39, 1 }
 0x1f9   : > { %v670_v44 = vadd.f32 %v669_v40, %v668_v36  ;;  %v686_v45 = vadd.f32 %v685_v41, %v684_v38  ;;  %v757_v59 = vadd.f32 %v756_v56, %v755_v37  ;;  %v814_v13 = vadd.f32 %v813_v10, %v812_v7 }
 0x1fa   : > { %v696_v46 = vadd.f32 %v695_v42, %v694_v39  ;;  %v836_v9 = vpop.xlane.xlu0 %835 }
 0x1fb   : > { %v758_v62 = vrot.slane %v757_v59, 1  ;;  %v837_v12 = vrot.slane %v836_v9, 4  ;;  %v815_v16 = vrot.slane %v814_v13, 2 }
 0x1fc   : > { %v826_v8 = vpop.xlane.xlu1 %825 }
 0x1fd   : > { %v759_v5 = vadd.f32 %v758_v62, %v757_v59  ;;  %v827_v11 = vrot.slane %v826_v8, 4  ;;  %v838_v15 = vadd.f32 %v837_v12, %v836_v9 }
 0x1ff   : > { %v828_v14 = vadd.f32 %v827_v11, %v826_v8 }
 0x200   : > { %v885_v27 = vpop.xlane.xlu1 %884 }
 0x201   : > { %v829_v18 = vrot.slane %v828_v14, 2  ;;  %v886_v30 = vrot.slane %v885_v27, 4 }
 0x203   : > { %v887_v33 = vadd.f32 %v886_v30, %v885_v27 }
 0x204   : > { %v909_v29 = vpop.xlane.xlu1 %908 }
 0x205   : > { %v888_v38 = vrot.slane %v887_v33, 2 }
 0x207   : > { %v889_v42 = vadd.f32 %v888_v38, %v887_v33 }
 0x226   : > { %s1183_s12 = spop %1182 }
 0x227   : > { %s477_s8 = smul.f32 %s1183_s12, %s472_s14  ;;  %s1907_s30 = spop %1184 }
 0x228   : > { %s1909_s13 = spop %1186 }
 0x229   : > { %s479_s28 = smul.f32 %s478_s15, %s477_s8  ;;  %s533_s16 = sadd.f32 %s1909_s13, %s1907_s30 }
 0x22a   : > { %s1189_s17 = spop %1188  ;;  %s531_s10 = ssub.f32 0.0, %s1909_s13 }
 0x22b   : > { %s480_s25 = ssub.f32 %s1890_s11, %s479_s28  ;;  %p528_p3 = scmp.eq.f32.partialorder %s1189_s17, 0.0 }
 0x22c   : > { %s1029_s28 = scalar_lea.smem %s1882_s6, 2 [#allocation10] }
 0x22d   : > { %483 = sst [smem:[%s1026_s29]] %s480_s25 }
 0x22e   : > { %s529_s18 = scalar_select %p528_p3, 1, 0 }
 0x230   : > { %s1916_s14 = scvt.s32.f32 %s529_s18 }
 0x232   : > { %s534_s27 = sadd.f32 %s1189_s17, %s1916_s14  ;;  %s1920_s24 = smul.f32 %s531_s10, %s1916_s14 }
 0x233   : > { %s539_s7 = ssub.f32 1.0, %s1916_s14 }
 0x234   : > { %v535_v60 = vstv %s534_s27 }
 0x235   : > { %1333 = vrcp.f32 %v535_v60  ;;  %v767_v60 = vadd.f32 %v766_v57, %v765_v53 }
 0x237   : > { %v768_v63 = vrot.slane %v767_v60, 1 }
 0x239   : > { %v769_v6 = vadd.f32 %v768_v63, %v767_v60 }
 0x23f   : > { %v1334_v19 = vpop.eup %1333 }
 0x240   : > { %1190 = vpush %v1334_v19  ;;  %v839_v19 = vrot.slane %v838_v15, 2 }
 0x241   : > { %1192 = vpush %v565_v20  ;;  %v816_v20 = vadd.f32 %v815_v16, %v814_v13 }
 0x242   : > { %1194 = vpush %v577_v21  ;;  %v830_v21 = vadd.f32 %v829_v18, %v828_v14  ;;  %v840_v22 = vadd.f32 %v839_v19, %v838_v15 }
 0x243   : > { %1196 = vpush %v587_v0  ;;  %v817_v23 = vrot.slane %v816_v20, 1 }
 0x244   : > { %v831_v0 = vrot.slane %v830_v21, 1  ;;  %v841_v3 = vrot.slane %v840_v22, 1 }
 0x245   : > { %v818_v24 = vadd.f32 %v817_v23, %v816_v20 }
 0x246   : > { %v832_v25 = vadd.f32 %v831_v0, %v830_v21  ;;  %v842_v26 = vadd.f32 %v841_v3, %v840_v22 }
 0x271   : > { %s1191_s9 = spop %1190 }
 0x272   : > { %s538_s11 = smul.f32 %s1191_s9, %s533_s16  ;;  %s1930_s12 = spop %1192 }
 0x273   : > { %s1932_s15 = spop %1194 }
 0x274   : > { %s540_s8 = smul.f32 %s539_s7, %s538_s11  ;;  %s594_s29 = sadd.f32 %s1932_s15, %s1930_s12 }
 0x275   : > { %s1197_s17 = spop %1196  ;;  %s592_s13 = ssub.f32 0.0, %s1932_s15 }
 0x276   : > { %s541_s25 = ssub.f32 %s1920_s24, %s540_s8  ;;  %p589_p5 = scmp.eq.f32.partialorder %s1197_s17, 0.0 }
 0x277   : > { %s1032_s8 = scalar_lea.smem %s1882_s6, 3 [#allocation10] }
 0x278   : > { %544 = sst [smem:[%s1029_s28]] %s541_s25 }
 0x279   : > { %s590_s30 = scalar_select %p589_p5, 1, 0 }
 0x27b   : > { %s1939_s16 = scvt.s32.f32 %s590_s30 }
 0x27c   : > { %v899_v28 = vpop.xlane.xlu0 %898 }
 0x27d   : > { %s595_s18 = sadd.f32 %s1197_s17, %s1939_s16  ;;  %s1943_s10 = smul.f32 %s592_s13, %s1939_s16  ;;  %v900_v31 = vrot.slane %v899_v28, 4 }
 0x27e   : > { %s600_s27 = ssub.f32 1.0, %s1939_s16 }
 0x27f   : > { %v596_v32 = vstv %s595_s18  ;;  %v901_v35 = vadd.f32 %v900_v31, %v899_v28 }
 0x280   : > { %1335 = vrcp.f32 %v596_v32  ;;  %v910_v32 = vrot.slane %v909_v29, 4 }
 0x281   : > { %v902_v40 = vrot.slane %v901_v35, 2 }
 0x282   : > { %v911_v36 = vadd.f32 %v910_v32, %v909_v29 }
 0x284   : > { %v912_v41 = vrot.slane %v911_v36, 2 }
 0x28a   : > { %v1336_v43 = vpop.eup %1335 }
 0x28b   : > { %1198 = vpush %v1336_v43  ;;  %v903_v43 = vadd.f32 %v902_v40, %v901_v35 }
 0x28c   : > { %1200 = vpush %v670_v44  ;;  %v913_v44 = vadd.f32 %v912_v41, %v911_v36 }
 0x28d   : > { %1202 = vpush %v686_v45  ;;  %v890_v45 = vrot.slane %v889_v42, 1 }
 0x28e   : > { %1204 = vpush %v696_v46  ;;  %v904_v46 = vrot.slane %v903_v43, 1  ;;  %v914_v47 = vrot.slane %v913_v44, 1 }
 0x28f   : > { %v891_v49 = vadd.f32 %v890_v45, %v889_v42 }
 0x290   : > { %v905_v50 = vadd.f32 %v904_v46, %v903_v43  ;;  %v915_v51 = vadd.f32 %v914_v47, %v913_v44 }
 0x2bc   : > { %s1199_s14 = spop %1198 }
 0x2bd   : > { %s599_s24 = smul.f32 %s1199_s14, %s594_s29  ;;  %s1949_s9 = spop %1200 }
 0x2be   : > { %s1951_s7 = spop %1202 }
 0x2bf   : > { %s601_s11 = smul.f32 %s600_s27, %s599_s24  ;;  %s703_s28 = sadd.f32 %s1951_s7, %s1949_s9 }
 0x2c0   : > { %s1205_s17 = spop %1204  ;;  %s701_s15 = ssub.f32 0.0, %s1951_s7 }
 0x2c1   : > { %s602_s25 = ssub.f32 %s1943_s10, %s601_s11  ;;  %p698_p8 = scmp.eq.f32.partialorder %s1205_s17, 0.0 }
 0x2c3   : > { %605 = sst [smem:[%s1032_s8]] %s602_s25 }
 0x2c4   : > { %s699_s12 = scalar_select %p698_p8, 1, 0 }
 0x2c6   : > { %s1958_s29 = scvt.s32.f32 %s699_s12 }
 0x2c8   : > { %s704_s6 = sadd.f32 %s1205_s17, %s1958_s29  ;;  %s1962_s30 = smul.f32 %s701_s15, %s1958_s29 }
 0x2c9   : > { %s709_s16 = ssub.f32 1.0, %s1958_s29  ;;  %s1977_s17 = scalar_lea.smem [#allocation11], %s1119_s21 }
 0x2ca   : > { %v705_v55 = vstv %s704_s6 }
 0x2cb   : > { %1337 = vrcp.f32 %v705_v55 }
 0x2d5   : > { %v1338_v2 = vpop.eup %1337 }
 0x2d6   : > { %1206 = vpush %v1338_v2 }
 0x2d7   : > { %1208 = vpush %v745_v4 }
 0x2d8   : > { %1210 = vpush %v759_v5 }
 0x2d9   : > { %1212 = vpush %v769_v6 }
 0x307   : > { %s1207_s13 = spop %1206 }
 0x308   : > { %s708_s18 = smul.f32 %s1207_s13, %s703_s28  ;;  %s1968_s10 = spop %1208 }
 0x309   : > { %s1970_s14 = spop %1210 }
 0x30a   : > { %s710_s27 = smul.f32 %s709_s16, %s708_s18  ;;  %s776_s24 = sadd.f32 %s1970_s14, %s1968_s10 }
 0x30b   : > { %s1213_s11 = spop %1212  ;;  %s774_s7 = ssub.f32 0.0, %s1970_s14 }
 0x30c   : > { %s711_s8 = ssub.f32 %s1962_s30, %s710_s27  ;;  %p771_p1 = scmp.eq.f32.partialorder %s1213_s11, 0.0 }
 0x30d   : > { %s1037_s16 = scalar_lea.smem %s1977_s17, 1 [#allocation11] }
 0x30e   : > { %713 = sst [smem:[%s1977_s17]] %s711_s8 }
 0x30f   : > { %s772_s9 = scalar_select %p771_p1, 1, 0 }
 0x311   : > { %s1981_s28 = scvt.s32.f32 %s772_s9 }
 0x313   : > { %s777_s25 = sadd.f32 %s1213_s11, %s1981_s28  ;;  %s1985_s12 = smul.f32 %s774_s7, %s1981_s28 }
 0x314   : > { %s782_s15 = ssub.f32 1.0, %s1981_s28 }
 0x315   : > { %v778_v17 = vstv %s777_s25  ;;  %s1465_s25 = scalar_lea.hbm %s2071_s4, 32 }
 0x316   : > { %1339 = vrcp.f32 %v778_v17  ;;  %p1466_p4 = scmp.ne.s32.totalorder %s2071_s4, %s1465_s25  ;;  %p1471_p12 = scmp.lt.u32.totalorder %s1465_s25, %s2071_s4 }
 0x318   : > { %p1467_p13 = pnand %p1466_p4, %p1262_p11 }
 0x31a   : > { %p1468_p7 = pneg %p1467_p13 }
 0x31c   : > { %p1473_p10 = pnand %p1471_p12, %p1468_p7 }
 0x320   : > { %v1340_v1 = vpop.eup %1339 }
 0x321   : > { %1214 = vpush %v1340_v1 }
 0x322   : > { %1216 = vpush %v818_v24 }
 0x323   : > { %1218 = vpush %v832_v25 }
 0x324   : > { %1220 = vpush %v842_v26 }
 0x352   : > { %s1215_s21 = spop %1214 }
 0x353   : > { %s781_s29 = smul.f32 %s1215_s21, %s776_s24  ;;  %s1991_s6 = spop %1216 }
 0x354   : > { %s1993_s30 = spop %1218 }
 0x355   : > { %s783_s13 = smul.f32 %s782_s15, %s781_s29  ;;  %s849_s18 = sadd.f32 %s1993_s30, %s1991_s6 }
 0x356   : > { %s1221_s27 = spop %1220  ;;  %s847_s14 = ssub.f32 0.0, %s1993_s30 }
 0x357   : > { %s784_s11 = ssub.f32 %s1985_s12, %s783_s13  ;;  %p844_p9 = scmp.eq.f32.partialorder %s1221_s27, 0.0 }
 0x359   : > { %786 = sst [smem:[%s1037_s16]] %s784_s11 }
 0x35a   : > { %s845_s10 = scalar_select %p844_p9, 1, 0 }
 0x35c   : > { %s2000_s24 = scvt.s32.f32 %s845_s10 }
 0x35e   : > { %s850_s8 = sadd.f32 %s1221_s27, %s2000_s24  ;;  %s2004_s9 = smul.f32 %s847_s14, %s2000_s24 }
 0x360   : > { %v851_v39 = vstv %s850_s8 }
 0x361   : > { %1341 = vrcp.f32 %v851_v39 }
 0x36b   : > { %v1342_v48 = vpop.eup %1341 }
 0x36c   : > { %1222 = vpush %v1342_v48 }
 0x36d   : > { %1224 = vpush %v891_v49 }
 0x36e   : > { %1226 = vpush %v905_v50 }
 0x36f   : > { %1228 = vpush %v915_v51 }
 0x370   : > { %1476 = shalt.err (!%p1473_p10)
}
 0x371   : > { %s1550_s13 = smov [#allocation10]   ;;  %s855_s10 = ssub.f32 1.0, %s2000_s24 }
 0x372   : > { %1241 = dma.smem_to_hbm (%p1262_p11), %s1550_s13, 32, %s2071_s4, [#allocation4]  }
 0x373   : > { %s1040_s25 = scalar_lea.smem %s1977_s17, 2 [#allocation11] }
 0x39d   : > { %s1223_s11 = spop %1222 }
 0x39e   : > { %s854_s14 = smul.f32 %s1223_s11, %s849_s18  ;;  %s1225_s8 = spop %1224 }
 0x39f   : > { %s1227_s7 = spop %1226  ;;  %s1043_s11 = scalar_lea.smem %s1977_s17, 3 [#allocation11] }
 0x3a0   : > { %s856_s28 = smul.f32 %s855_s10, %s854_s14  ;;  %s922_s12 = sadd.f32 %s1227_s7, %s1225_s8 }
 0x3a1   : > { %s1229_s21 = spop %1228  ;;  %s920_s16 = ssub.f32 0.0, %s1227_s7 }
 0x3a2   : > { %s857_s15 = ssub.f32 %s2004_s9, %s856_s28  ;;  %p917_p0 = scmp.eq.f32.partialorder %s1229_s21, 0.0 }
 0x3a3   : > { %s1477_s8 = scalar_lea.hbm %s2072_s5, 32 }
 0x3a4   : > { %859 = sst [smem:[%s1040_s25]] %s857_s15  ;;  %p1478_p6 = scmp.ne.s32.totalorder %s2072_s5, %s1477_s8 }
 0x3a5   : > { %s918_s29 = scalar_select %p917_p0, 1, 0 }
 0x3a6   : > { %p1479_p2 = pnand %p1478_p6, %p1262_p11  ;;  %p1483_p5 = scmp.lt.u32.totalorder %s1477_s8, %s2072_s5 }
 0x3a7   : > { %s919_s27 = scvt.s32.f32 %s918_s29 }
 0x3a8   : > { %p1480_p3 = pneg %p1479_p2 }
 0x3a9   : > { %s923_s0 = sadd.f32 %s1229_s21, %s919_s27  ;;  %s921_s13 = smul.f32 %s920_s16, %s919_s27 }
 0x3aa   : > { %s928_s18 = ssub.f32 1.0, %s919_s27  ;;  %p1485_p8 = pnand %p1483_p5, %p1480_p3 }
 0x3ab   : > { %v924_v52 = vstv %s923_s0 }
 0x3ac   : > { %1343 = vrcp.f32 %v924_v52 }
 0x3b6   : > { %v1344_v34 = vpop.eup %1343 }
 0x3b7   : > { %1230 = vpush %v1344_v34 }
 0x3e8   : > { %s1231_s6 = spop %1230 }
 0x3e9   : > { %s927_s30 = smul.f32 %s1231_s6, %s922_s12 }
 0x3eb   : > { %s929_s24 = smul.f32 %s928_s18, %s927_s30 }
 0x3ed   : > { %s930_s10 = ssub.f32 %s921_s13, %s929_s24 }
 0x3ef   : > { %932 = sst [smem:[%s1043_s11]] %s930_s10 }
 0x3f0   : > { %1488 = shalt.err (!%p1485_p8)
}
 0x3f1   : > { %s1551_s17 = smov [#allocation11]  }
 0x3f2   : > { %1243 = dma.smem_to_hbm (%p1262_p11), %s1551_s17, 32, %s2072_s5, [#allocation12]  }
 0x3f3   : > { %1518 = dma.done.wait (%p1262_p11), [#allocation4], 32  }
 0x3f4   : > { %1520 = vsyncadd (%p1262_p11), [#allocation4], 4294967264 }
 0x3f5   : > { %1522 = dma.done.wait (%p1262_p11), [#allocation12], 32  }
 0x3f6   : > { %1524 = vsyncadd (%p1262_p11), [#allocation12], 4294967264 }
 0x3f7   : > { %959 = sfence }
 0x3f8 PF: > { %p24_p1 = scmp.ge.s32.totalorder %s1604_s23, 4   ;;  %s2089_s18 = smov %s1531_s19 }
 0x3f9   : > { %s2090_s19 = smov %s1535_s20  ;;  %s2091_s20 = smov %s1614_s26 }
 0x3fa   : > { %s2092_s21 = smov %s1604_s23  ;;  %26 = sbr.rel (!%p24_p1) target bundleno = 11 (0xb), region = 132 }
 0x401   :  { %965 = vsyncpa [#allocation3], 1 }
 0x402   :  { %967 = vsyncpa [#allocation3 + $0x1], 1 }
 0x403   :  { %968 = vsyncpa [#allocation6], 1 }
 0x404   :  { %970 = vsyncpa [#allocation6 + $0x1], 1 }
 0x405   :  { %971 = vsyncpa [#allocation9], 1 }
 0x406   :  { %973 = vsyncpa [#allocation9 + $0x1], 1 }
 0x407   :  { %974 = vsyncpa [#allocation4], 1 }
 0x408   :  { %976 = vsyncpa [#allocation4 + $0x1], 1 }
 0x409   :  { %977 = vsyncpa [#allocation12], 1 }

</bundles_post_ra>
